<compile_context>
chip_gen: v7x
topology: tpu7x:2x2x1
jax: 0.10.0
libtpu: 0.0.40
codegen_flags: <defaults>
</compile_context>

<pallas_src>
import math
import functools

import jax
import jax.numpy as jnp
from jax.experimental import pallas as pl
from jax.experimental.pallas import tpu as pltpu


def _layernorm(x, w, b, n_real, eps=1e-5):
    # Statistics over the *real* embedding width only (columns >= n_real are zero
    # padding added by the wrapper for lane density).  Uncentered variance keeps the
    # padded columns from biasing the stats, and maps padded columns exactly to 0
    # because the padded LN weight/bias are 0.
    inv_n = 1.0 / n_real
    mu = jnp.sum(x, axis=-1, keepdims=True) * inv_n
    var = jnp.sum(x * x, axis=-1, keepdims=True) * inv_n - mu * mu
    return (x - mu) * jax.lax.rsqrt(var + eps) * w + b


def _gelu_tanh(x):
    # tanh-form GELU: tanh lowers to the EUP slot instead of a long VPU polynomial.
    c = 0.7978845608028654  # sqrt(2/pi)
    return 0.5 * x * (1.0 + jnp.tanh(c * (x + 0.044715 * x * x * x)))


def attention_block_kernel(num_heads, embed_dim, tq,
                           x_ref,
                           ln1w_ref, ln1b_ref,
                           wq_ref, bq_ref, wkv_ref, bkv_ref,
                           wo_ref, bo_ref,
                           ln2w_ref, ln2b_ref,
                           w1_ref, b1_ref, w2_ref, b2_ref,
                           o_ref,
                           kt_scr, v_scr, ctx_scr):
    E = embed_dim                      # real embed dim (<= padded lane width Ep)
    H = num_heads
    D = E // H
    t = pl.program_id(1)

    # ---- Hoisted, once per batch (t == 0): LN1 over the full sequence + fused K|V
    #      projection, stored bf16 / head-major in persistent VMEM scratch. ----
    @pl.when(t == 0)
    def _():
        x_full = x_ref[0]                                                  # (S, Ep) f32
        inp_full = _layernorm(x_full, ln1w_ref[...], ln1b_ref[...], E)
        kv = (jnp.dot(inp_full.astype(jnp.bfloat16), wkv_ref[...],
                      preferred_element_type=jnp.float32)
              + bkv_ref[...]).astype(jnp.bfloat16)                         # (S, 2E) bf16; f32 kv discarded
        kt = kv[:, :E].T                                                   # ONE K transpose per batch
        for h in range(H):                                                 # amortized over all query tiles
            kt_scr[h] = kt[h * D:(h + 1) * D, :]                           # (D, S)
            v_scr[h] = kv[:, E + h * D:E + (h + 1) * D]                    # (S, D)

    # ---- Per query tile ----
    qstart = pl.multiple_of(t * tq, tq)
    x_tile = x_ref[0, pl.ds(qstart, tq), :]                                # (TQ, Ep) f32
    inp_tile = _layernorm(x_tile, ln1w_ref[...], ln1b_ref[...], E)
    q = jnp.dot(inp_tile.astype(jnp.bfloat16), wq_ref[...],
                preferred_element_type=jnp.float32) + bq_ref[...]          # (TQ, E); 1/sqrt(D) pre-folded
    q_bf = q.astype(jnp.bfloat16)

    # Per-head attention: K^T / V read head-major from scratch (leading-dim index);
    # head outputs written straight into the ctx scratch (no lane concatenate).
    # TODO(synk): for large H*TQ*S, switch to lax.fori_loop over pl.ds(h*D, D) to
    # bound live score-buffer ranges; and tile the K/V (S) axis flash-style.
    for h in range(H):
        s = jnp.dot(q_bf[:, h * D:(h + 1) * D], kt_scr[h],
                    preferred_element_type=jnp.float32)                    # (TQ, S)
        s = s - jnp.max(s, axis=-1, keepdims=True)
        p = jnp.exp(s)
        p = p * pl.reciprocal(jnp.sum(p, axis=-1, keepdims=True), approx=True)
        ctx_scr[:, h * D:(h + 1) * D] = jnp.dot(
            p.astype(jnp.bfloat16), v_scr[h],
            preferred_element_type=jnp.float32).astype(jnp.bfloat16)

    attn = jnp.dot(ctx_scr[...], wo_ref[...],
                   preferred_element_type=jnp.float32) + bo_ref[...]       # (TQ, Ep)
    x1 = x_tile + attn

    # ---- LayerNorm 2 + MLP (Linear -> GELU -> Linear) + residual ----
    h0 = _layernorm(x1, ln2w_ref[...], ln2b_ref[...], E)
    h1 = jnp.dot(h0.astype(jnp.bfloat16), w1_ref[...],
                 preferred_element_type=jnp.float32) + b1_ref[...]
    h1 = _gelu_tanh(h1)
    h2 = jnp.dot(h1.astype(jnp.bfloat16), w2_ref[...],
                 preferred_element_type=jnp.float32) + b2_ref[...]
    o_ref[0] = (x1 + h2).astype(o_ref.dtype)


def _round_up(n, m):
    return ((n + m - 1) // m) * m


def _vmem_capacity_bytes():
    try:
        return int(pltpu.get_tpu_info().vmem_capacity_bytes)
    except Exception:
        return 64 * 1024 * 1024   # conservative (v7x-sized) fallback


def _pick_tq(S, Ep, Hidp, vmem_bytes):
    # Pick the largest query tile whose per-tile f32 working set fits in ~1/4 of
    # VMEM (rest reserved for weights, the persistent bf16 K^T/V scratch, the x
    # block, and double-buffering).  256 first for v6e's 256-wide MXU; v7x's
    # smaller VMEM trims it via the budget; on v5e 128 would be equally good.
    for tq in (256, 128, 64, 32, 16, 8):
        if S % tq:
            continue
        per_tile = (2 * tq * S * 4          # scores / probs
                    + 5 * tq * Ep * 4       # q / x_tile / x1 / LN temps / attn
                    + 2 * tq * Hidp * 4)    # MLP hidden
        if per_tile <= vmem_bytes // 4:
            return tq
    return S


def attention_block(x, params, num_heads):
    """x: (B, S, E) float32; params hold PyTorch-layout weights."""
    B, S, E = x.shape
    hid = params["lin1_w"].shape[0]
    H = num_heads
    assert E % H == 0
    D = E // H
    scale = 1.0 / math.sqrt(D)

    # Lane-dense padding (zeros) of embed/hidden dims to multiples of 128; no-op
    # when the model dims are already dense.  LayerNorm uses the real width, so
    # padded columns stay exactly zero end-to-end and are sliced off at the end.
    Ep = _round_up(E, 128)
    Hidp = _round_up(hid, 128)

    def pad2(w, r, c):
        return jnp.zeros((r, c), w.dtype).at[:w.shape[0], :w.shape[1]].set(w)

    def pad1(v, n):
        return jnp.zeros((n,), v.dtype).at[:v.shape[0]].set(v)

    wq, wk, wv = jnp.split(params["in_proj_w"], 3, axis=0)   # each (E, E), PyTorch (out, in)
    bq, bk, bv = jnp.split(params["in_proj_b"], 3, axis=0)

    # Fold the 1/sqrt(D) scale into the Q projection; fuse K and V into one matmul.
    wq_s = pad2(wq.T * scale, Ep, E).astype(jnp.bfloat16)                      # (Ep, E)
    bq_s = (bq * scale).reshape(1, E).astype(jnp.float32)
    wkv = pad2(jnp.concatenate([wk.T, wv.T], axis=1), Ep, 2 * E).astype(jnp.bfloat16)  # (Ep, 2E)
    bkv = jnp.concatenate([bk, bv]).reshape(1, 2 * E).astype(jnp.float32)

    wo = pad2(params["out_proj_w"].T, E, Ep).astype(jnp.bfloat16)              # (E, Ep)
    bo = pad1(params["out_proj_b"], Ep).reshape(1, Ep).astype(jnp.float32)
    w1 = pad2(params["lin1_w"].T, Ep, Hidp).astype(jnp.bfloat16)               # (Ep, Hidp)
    b1 = pad1(params["lin1_b"], Hidp).reshape(1, Hidp).astype(jnp.float32)
    w2 = pad2(params["lin2_w"].T, Hidp, Ep).astype(jnp.bfloat16)               # (Hidp, Ep)
    b2 = pad1(params["lin2_b"], Ep).reshape(1, Ep).astype(jnp.float32)
    ln1w = pad1(params["ln1_w"], Ep).reshape(1, Ep).astype(jnp.float32)
    ln1b = pad1(params["ln1_b"], Ep).reshape(1, Ep).astype(jnp.float32)
    ln2w = pad1(params["ln2_w"], Ep).reshape(1, Ep).astype(jnp.float32)
    ln2b = pad1(params["ln2_b"], Ep).reshape(1, Ep).astype(jnp.float32)

    x_p = x if Ep == E else jnp.pad(x, ((0, 0), (0, 0), (0, Ep - E)))

    vmem_bytes = _vmem_capacity_bytes()
    TQ = _pick_tq(S, Ep, Hidp, vmem_bytes)
    NQ = S // TQ

    args = [
        x_p,
        ln1w, ln1b,
        wq_s, bq_s, wkv, bkv,
        wo, bo,
        ln2w, ln2b,
        w1, b1, w2, b2,
    ]

    # Constant-index weight/bias blocks: the pipeline keeps the resident copy across
    # grid steps (no re-DMA).  TODO(synk): on v7x with very large E/hid, single-buffer
    # these (pipeline_mode=pl.Buffered(1)) to halve their VMEM footprint.
    def const_spec(a):
        zeros = (0,) * a.ndim
        return pl.BlockSpec(a.shape, lambda b, t, _z=zeros: _z)

    in_specs = ([pl.BlockSpec((1, S, Ep), lambda b, t: (b, 0, 0))]   # full seq once per batch
                + [const_spec(a) for a in args[1:]])
    out_spec = pl.BlockSpec((1, TQ, Ep), lambda b, t: (b, t, 0))

    out = pl.pallas_call(
        functools.partial(attention_block_kernel, H, E, TQ),
        out_shape=jax.ShapeDtypeStruct((B, S, Ep), x.dtype),
        grid=(B, NQ),
        in_specs=in_specs,
        out_specs=out_spec,
        scratch_shapes=[
            pltpu.VMEM((H, D, S), jnp.bfloat16),   # K^T, head-major; persists across query tiles
            pltpu.VMEM((H, S, D), jnp.bfloat16),   # V,  head-major
            pltpu.VMEM((TQ, E), jnp.bfloat16),     # per-tile concatenated head outputs (ctx)
        ],
        compiler_params=pltpu.CompilerParams(
            # Batch axis parallel (v7x megacore split); the query-tile axis MUST be
            # "arbitrary" because the K/V scratch is carried across it.
            dimension_semantics=("parallel", "arbitrary"),
            vmem_limit_bytes=min(vmem_bytes * 3 // 4, 64 * 1024 * 1024),
        ),
    )(*args)

    return out if Ep == E else out[..., :E]


def reference(x, p, num_heads):
    """Pure-JAX f32 reference mirroring the PyTorch forward pass (exact erf-GELU)."""
    B, S, E = x.shape
    D = E // num_heads

    def ln(v, w, b):
        mu = v.mean(-1, keepdims=True)
        var = ((v - mu) ** 2).mean(-1, keepdims=True)
        return (v - mu) / jnp.sqrt(var + 1e-5) * w + b

    inp = ln(x, p["ln1_w"], p["ln1_b"])
    wq, wk, wv = jnp.split(p["in_proj_w"], 3, axis=0)
    bq, bk, bv = jnp.split(p["in_proj_b"], 3, axis=0)
    q = inp @ wq.T + bq
    k = inp @ wk.T + bk
    v = inp @ wv.T + bv

    def split_heads(t):
        return t.reshape(B, S, num_heads, D).transpose(0, 2, 1, 3)

    qh, kh, vh = map(split_heads, (q, k, v))
    s = jnp.einsum("bhsd,bhtd->bhst", qh, kh) / jnp.sqrt(float(D))
    a = jax.nn.softmax(s, axis=-1)
    o = jnp.einsum("bhst,bhtd->bhsd", a, vh).transpose(0, 2, 1, 3).reshape(B, S, E)
    attn_out = o @ p["out_proj_w"].T + p["out_proj_b"]
    x1 = x + attn_out
    h = ln(x1, p["ln2_w"], p["ln2_b"])
    h = h @ p["lin1_w"].T + p["lin1_b"]
    h = jax.nn.gelu(h, approximate=False)
    h = h @ p["lin2_w"].T + p["lin2_b"]
    return x1 + h


if __name__ == "__main__":
    B, S, E, HID, NH = 2, 8, 32, 64, 4  # batch, seq, embed_dim, hidden_dim, num_heads
    key = jax.random.PRNGKey(0)
    keys = jax.random.split(key, 12)

    params = {
        "ln1_w": jnp.ones((E,), jnp.float32),
        "ln1_b": jnp.zeros((E,), jnp.float32),
        "in_proj_w": 0.1 * jax.random.normal(keys[0], (3 * E, E), jnp.float32),
        "in_proj_b": 0.1 * jax.random.normal(keys[1], (3 * E,), jnp.float32),
        "out_proj_w": 0.1 * jax.random.normal(keys[2], (E, E), jnp.float32),
        "out_proj_b": 0.1 * jax.random.normal(keys[3], (E,), jnp.float32),
        "ln2_w": 1.0 + 0.1 * jax.random.normal(keys[4], (E,), jnp.float32),
        "ln2_b": 0.1 * jax.random.normal(keys[5], (E,), jnp.float32),
        "lin1_w": 0.1 * jax.random.normal(keys[6], (HID, E), jnp.float32),
        "lin1_b": 0.1 * jax.random.normal(keys[7], (HID,), jnp.float32),
        "lin2_w": 0.1 * jax.random.normal(keys[8], (E, HID), jnp.float32),
        "lin2_b": 0.1 * jax.random.normal(keys[9], (E,), jnp.float32),
    }
    x = jax.random.normal(keys[10], (B, S, E), jnp.float32)

    out = attention_block(x, params, NH)
    jax.block_until_ready(out)

    ref = reference(x, params, NH)
    # bf16 MXU inputs (f32 accumulation) + tanh-GELU + approx reciprocal -> compare
    # against the pure-f32 reference at bf16-level tolerance.
    max_err = float(jnp.max(jnp.abs(out - ref)))
    assert max_err < 2e-2, f"mismatch vs reference: {max_err}"
    print("KERNEL_OK")
</pallas_src>

<mosaic_0001>
module attributes {stable_mosaic.version = 11 : i64} {
  func.func @attention_block_kernel(%arg0: i32, %arg1: i32, %arg2: memref<1x8x128xf32, #tpu.memory_space<vmem>>, %arg3: memref<1x128xf32, #tpu.memory_space<vmem>>, %arg4: memref<1x128xf32, #tpu.memory_space<vmem>>, %arg5: memref<128x32xbf16, #tpu.memory_space<vmem>>, %arg6: memref<1x32xf32, #tpu.memory_space<vmem>>, %arg7: memref<128x64xbf16, #tpu.memory_space<vmem>>, %arg8: memref<1x64xf32, #tpu.memory_space<vmem>>, %arg9: memref<32x128xbf16, #tpu.memory_space<vmem>>, %arg10: memref<1x128xf32, #tpu.memory_space<vmem>>, %arg11: memref<1x128xf32, #tpu.memory_space<vmem>>, %arg12: memref<1x128xf32, #tpu.memory_space<vmem>>, %arg13: memref<128x128xbf16, #tpu.memory_space<vmem>>, %arg14: memref<1x128xf32, #tpu.memory_space<vmem>>, %arg15: memref<128x128xbf16, #tpu.memory_space<vmem>>, %arg16: memref<1x128xf32, #tpu.memory_space<vmem>>, %arg17: memref<1x8x128xf32, #tpu.memory_space<vmem>>, %arg18: memref<4x8x8xbf16, #tpu.memory_space<vmem>>, %arg19: memref<4x8x8xbf16, #tpu.memory_space<vmem>>, %arg20: memref<8x32xbf16, #tpu.memory_space<vmem>>) attributes {dimension_semantics = [#tpu.dimension_semantics<parallel>, #tpu.dimension_semantics<arbitrary>], iteration_bounds = array<i64: 2, 1>, scalar_prefetch = 0 : i64, scratch_operands = 3 : i64, tpu.core_type = #tpu.core_type<tc>, window_params = [{transform_indices = @transform_0, window_bounds = array<i64: 1, 8, 128>}, {pipeline_mode = #tpu.pipeline_mode<synchronous>, transform_indices = @transform_1, window_bounds = array<i64: 1, 128>}, {pipeline_mode = #tpu.pipeline_mode<synchronous>, transform_indices = @transform_2, window_bounds = array<i64: 1, 128>}, {pipeline_mode = #tpu.pipeline_mode<synchronous>, transform_indices = @transform_3, window_bounds = array<i64: 128, 32>}, {pipeline_mode = #tpu.pipeline_mode<synchronous>, transform_indices = @transform_4, window_bounds = array<i64: 1, 32>}, {pipeline_mode = #tpu.pipeline_mode<synchronous>, transform_indices = @transform_5, window_bounds = array<i64: 128, 64>}, {pipeline_mode = #tpu.pipeline_mode<synchronous>, transform_indices = @transform_6, window_bounds = array<i64: 1, 64>}, {pipeline_mode = #tpu.pipeline_mode<synchronous>, transform_indices = @transform_7, window_bounds = array<i64: 32, 128>}, {pipeline_mode = #tpu.pipeline_mode<synchronous>, transform_indices = @transform_8, window_bounds = array<i64: 1, 128>}, {pipeline_mode = #tpu.pipeline_mode<synchronous>, transform_indices = @transform_9, window_bounds = array<i64: 1, 128>}, {pipeline_mode = #tpu.pipeline_mode<synchronous>, transform_indices = @transform_10, window_bounds = array<i64: 1, 128>}, {pipeline_mode = #tpu.pipeline_mode<synchronous>, transform_indices = @transform_11, window_bounds = array<i64: 128, 128>}, {pipeline_mode = #tpu.pipeline_mode<synchronous>, transform_indices = @transform_12, window_bounds = array<i64: 1, 128>}, {pipeline_mode = #tpu.pipeline_mode<synchronous>, transform_indices = @transform_13, window_bounds = array<i64: 128, 128>}, {pipeline_mode = #tpu.pipeline_mode<synchronous>, transform_indices = @transform_14, window_bounds = array<i64: 1, 128>}, {transform_indices = @transform_15, window_bounds = array<i64: 1, 8, 128>}]} {
    %c0_i32 = arith.constant 0 : i32
    %0 = arith.cmpi eq, %arg1, %c0_i32 : i32
    %1 = arith.extui %0 : i1 to i32
    %c0_i32_0 = arith.constant 0 : i32
    %2 = arith.cmpi ne, %1, %c0_i32_0 : i32
    scf.if %2 {
      %c0_90 = arith.constant 0 : index
      %c0_91 = arith.constant 0 : index
      %c0_92 = arith.constant 0 : index
      %179 = vector.load %arg2[%c0_90, %c0_91, %c0_92] : memref<1x8x128xf32, #tpu.memory_space<vmem>>, vector<1x8x128xf32>
      %180 = vector.shape_cast %179 : vector<1x8x128xf32> to vector<8x128xf32>
      %c0_93 = arith.constant 0 : index
      %c0_94 = arith.constant 0 : index
      %181 = vector.load %arg3[%c0_93, %c0_94] : memref<1x128xf32, #tpu.memory_space<vmem>>, vector<1x128xf32>
      %c0_95 = arith.constant 0 : index
      %c0_96 = arith.constant 0 : index
      %182 = vector.load %arg4[%c0_95, %c0_96] : memref<1x128xf32, #tpu.memory_space<vmem>>, vector<1x128xf32>
      %cst_97 = arith.constant dense<0.000000e+00> : vector<8xf32>
      %183 = vector.multi_reduction <add>, %180, %cst_97 [1] : vector<8x128xf32> to vector<8xf32>
      %184 = vector.shape_cast %183 : vector<8xf32> to vector<8x1xf32>
      %cst_98 = arith.constant 3.125000e-02 : f32
      %185 = vector.broadcast %cst_98 : f32 to vector<8x1xf32>
      %186 = arith.mulf %184, %185 : vector<8x1xf32>
      %187 = arith.mulf %180, %180 : vector<8x128xf32>
      %cst_99 = arith.constant dense<0.000000e+00> : vector<8xf32>
      %188 = vector.multi_reduction <add>, %187, %cst_99 [1] : vector<8x128xf32> to vector<8xf32>
      %189 = vector.shape_cast %188 : vector<8xf32> to vector<8x1xf32>
      %cst_100 = arith.constant 3.125000e-02 : f32
      %190 = vector.broadcast %cst_100 : f32 to vector<8x1xf32>
      %191 = arith.mulf %189, %190 : vector<8x1xf32>
      %192 = arith.mulf %186, %186 : vector<8x1xf32>
      %193 = arith.subf %191, %192 : vector<8x1xf32>
      %194 = vector.broadcast %186 : vector<8x1xf32> to vector<8x128xf32>
      %195 = arith.subf %180, %194 : vector<8x128xf32>
      %cst_101 = arith.constant 9.99999974E-6 : f32
      %196 = vector.broadcast %cst_101 : f32 to vector<8x1xf32>
      %197 = arith.addf %193, %196 : vector<8x1xf32>
      %198 = math.rsqrt %197 : vector<8x1xf32>
      %199 = vector.broadcast %198 : vector<8x1xf32> to vector<8x128xf32>
      %200 = arith.mulf %195, %199 : vector<8x128xf32>
      %201 = vector.broadcast %181 : vector<1x128xf32> to vector<8x128xf32>
      %202 = arith.mulf %200, %201 : vector<8x128xf32>
      %203 = vector.broadcast %182 : vector<1x128xf32> to vector<8x128xf32>
      %204 = arith.addf %202, %203 : vector<8x128xf32>
      %205 = arith.truncf %204 : vector<8x128xf32> to vector<8x128xbf16>
      %c0_102 = arith.constant 0 : index
      %c0_103 = arith.constant 0 : index
      %206 = vector.load %arg7[%c0_102, %c0_103] : memref<128x64xbf16, #tpu.memory_space<vmem>>, vector<128x64xbf16>
      %cst_104 = arith.constant dense<0.000000e+00> : vector<8x64xf32>
      %207 = tpu.matmul %205, %206, %cst_104 {dimension_numbers = #tpu.dot_dimension_numbers<[1], [0], [0], [1], [0, 0, 1, 1], [], []>} : vector<8x128xbf16>, vector<128x64xbf16>, vector<8x64xf32> -> vector<8x64xf32>
      %c0_105 = arith.constant 0 : index
      %c0_106 = arith.constant 0 : index
      %208 = vector.load %arg8[%c0_105, %c0_106] : memref<1x64xf32, #tpu.memory_space<vmem>>, vector<1x64xf32>
      %209 = vector.broadcast %208 : vector<1x64xf32> to vector<8x64xf32>
      %210 = arith.addf %207, %209 : vector<8x64xf32>
      %211 = arith.truncf %210 : vector<8x64xf32> to vector<8x64xbf16>
      %212 = vector.extract_strided_slice %211 {offsets = [0, 0], sizes = [8, 32], strides = [1, 1]} : vector<8x64xbf16> to vector<8x32xbf16>
      %213 = tpu.transpose %212, [1, 0] : vector<8x32xbf16> -> vector<32x8xbf16>
      %214 = vector.extract_strided_slice %213 {offsets = [0, 0], sizes = [8, 8], strides = [1, 1]} : vector<32x8xbf16> to vector<8x8xbf16>
      %c0_107 = arith.constant 0 : index
      %c0_108 = arith.constant 0 : index
      %c0_109 = arith.constant 0 : index
      %215 = vector.load %arg18[%c0_107, %c0_108, %c0_109] : memref<4x8x8xbf16, #tpu.memory_space<vmem>>, vector<1x8x8xbf16>
      %216 = vector.shape_cast %215 : vector<1x8x8xbf16> to vector<8x8xbf16>
      %217 = vector.shape_cast %214 : vector<8x8xbf16> to vector<1x8x8xbf16>
      tpu.vector_store %arg18[%c0_107, %c0_108, %c0_109], %217 {strides = array<i32>} : memref<4x8x8xbf16, #tpu.memory_space<vmem>>, vector<1x8x8xbf16>,
      %218 = vector.extract_strided_slice %211 {offsets = [0, 32], sizes = [8, 8], strides = [1, 1]} : vector<8x64xbf16> to vector<8x8xbf16>
      %c0_110 = arith.constant 0 : index
      %c0_111 = arith.constant 0 : index
      %c0_112 = arith.constant 0 : index
      %219 = vector.load %arg19[%c0_110, %c0_111, %c0_112] : memref<4x8x8xbf16, #tpu.memory_space<vmem>>, vector<1x8x8xbf16>
      %220 = vector.shape_cast %219 : vector<1x8x8xbf16> to vector<8x8xbf16>
      %221 = vector.shape_cast %218 : vector<8x8xbf16> to vector<1x8x8xbf16>
      tpu.vector_store %arg19[%c0_110, %c0_111, %c0_112], %221 {strides = array<i32>} : memref<4x8x8xbf16, #tpu.memory_space<vmem>>, vector<1x8x8xbf16>,
      %222 = vector.extract_strided_slice %213 {offsets = [8, 0], sizes = [8, 8], strides = [1, 1]} : vector<32x8xbf16> to vector<8x8xbf16>
      %c1_113 = arith.constant 1 : index
      %c0_114 = arith.constant 0 : index
      %c0_115 = arith.constant 0 : index
      %223 = vector.load %arg18[%c1_113, %c0_114, %c0_115] : memref<4x8x8xbf16, #tpu.memory_space<vmem>>, vector<1x8x8xbf16>
      %224 = vector.shape_cast %223 : vector<1x8x8xbf16> to vector<8x8xbf16>
      %225 = vector.shape_cast %222 : vector<8x8xbf16> to vector<1x8x8xbf16>
      tpu.vector_store %arg18[%c1_113, %c0_114, %c0_115], %225 {strides = array<i32>} : memref<4x8x8xbf16, #tpu.memory_space<vmem>>, vector<1x8x8xbf16>,
      %226 = vector.extract_strided_slice %211 {offsets = [0, 40], sizes = [8, 8], strides = [1, 1]} : vector<8x64xbf16> to vector<8x8xbf16>
      %c1_116 = arith.constant 1 : index
      %c0_117 = arith.constant 0 : index
      %c0_118 = arith.constant 0 : index
      %227 = vector.load %arg19[%c1_116, %c0_117, %c0_118] : memref<4x8x8xbf16, #tpu.memory_space<vmem>>, vector<1x8x8xbf16>
      %228 = vector.shape_cast %227 : vector<1x8x8xbf16> to vector<8x8xbf16>
      %229 = vector.shape_cast %226 : vector<8x8xbf16> to vector<1x8x8xbf16>
      tpu.vector_store %arg19[%c1_116, %c0_117, %c0_118], %229 {strides = array<i32>} : memref<4x8x8xbf16, #tpu.memory_space<vmem>>, vector<1x8x8xbf16>,
      %230 = vector.extract_strided_slice %213 {offsets = [16, 0], sizes = [8, 8], strides = [1, 1]} : vector<32x8xbf16> to vector<8x8xbf16>
      %c2_119 = arith.constant 2 : index
      %c0_120 = arith.constant 0 : index
      %c0_121 = arith.constant 0 : index
      %231 = vector.load %arg18[%c2_119, %c0_120, %c0_121] : memref<4x8x8xbf16, #tpu.memory_space<vmem>>, vector<1x8x8xbf16>
      %232 = vector.shape_cast %231 : vector<1x8x8xbf16> to vector<8x8xbf16>
      %233 = vector.shape_cast %230 : vector<8x8xbf16> to vector<1x8x8xbf16>
      tpu.vector_store %arg18[%c2_119, %c0_120, %c0_121], %233 {strides = array<i32>} : memref<4x8x8xbf16, #tpu.memory_space<vmem>>, vector<1x8x8xbf16>,
      %234 = vector.extract_strided_slice %211 {offsets = [0, 48], sizes = [8, 8], strides = [1, 1]} : vector<8x64xbf16> to vector<8x8xbf16>
      %c2_122 = arith.constant 2 : index
      %c0_123 = arith.constant 0 : index
      %c0_124 = arith.constant 0 : index
      %235 = vector.load %arg19[%c2_122, %c0_123, %c0_124] : memref<4x8x8xbf16, #tpu.memory_space<vmem>>, vector<1x8x8xbf16>
      %236 = vector.shape_cast %235 : vector<1x8x8xbf16> to vector<8x8xbf16>
      %237 = vector.shape_cast %234 : vector<8x8xbf16> to vector<1x8x8xbf16>
      tpu.vector_store %arg19[%c2_122, %c0_123, %c0_124], %237 {strides = array<i32>} : memref<4x8x8xbf16, #tpu.memory_space<vmem>>, vector<1x8x8xbf16>,
      %238 = vector.extract_strided_slice %213 {offsets = [24, 0], sizes = [8, 8], strides = [1, 1]} : vector<32x8xbf16> to vector<8x8xbf16>
      %c3_125 = arith.constant 3 : index
      %c0_126 = arith.constant 0 : index
      %c0_127 = arith.constant 0 : index
      %239 = vector.load %arg18[%c3_125, %c0_126, %c0_127] : memref<4x8x8xbf16, #tpu.memory_space<vmem>>, vector<1x8x8xbf16>
      %240 = vector.shape_cast %239 : vector<1x8x8xbf16> to vector<8x8xbf16>
      %241 = vector.shape_cast %238 : vector<8x8xbf16> to vector<1x8x8xbf16>
      tpu.vector_store %arg18[%c3_125, %c0_126, %c0_127], %241 {strides = array<i32>} : memref<4x8x8xbf16, #tpu.memory_space<vmem>>, vector<1x8x8xbf16>,
      %242 = vector.extract_strided_slice %211 {offsets = [0, 56], sizes = [8, 8], strides = [1, 1]} : vector<8x64xbf16> to vector<8x8xbf16>
      %c3_128 = arith.constant 3 : index
      %c0_129 = arith.constant 0 : index
      %c0_130 = arith.constant 0 : index
      %243 = vector.load %arg19[%c3_128, %c0_129, %c0_130] : memref<4x8x8xbf16, #tpu.memory_space<vmem>>, vector<1x8x8xbf16>
      %244 = vector.shape_cast %243 : vector<1x8x8xbf16> to vector<8x8xbf16>
      %245 = vector.shape_cast %242 : vector<8x8xbf16> to vector<1x8x8xbf16>
      tpu.vector_store %arg19[%c3_128, %c0_129, %c0_130], %245 {strides = array<i32>} : memref<4x8x8xbf16, #tpu.memory_space<vmem>>, vector<1x8x8xbf16>,
    } else {
    }
    %c8_i32 = arith.constant 8 : i32
    %3 = arith.muli %arg1, %c8_i32 : i32
    %4 = tpu.assume_multiple %3, 8 : i32
    %c0 = arith.constant 0 : index
    %5 = arith.index_cast %4 : i32 to index
    %c0_1 = arith.constant 0 : index
    %6 = vector.load %arg2[%c0, %5, %c0_1] : memref<1x8x128xf32, #tpu.memory_space<vmem>>, vector<1x8x128xf32>
    %7 = vector.shape_cast %6 : vector<1x8x128xf32> to vector<8x128xf32>
    %c0_2 = arith.constant 0 : index
    %c0_3 = arith.constant 0 : index
    %8 = vector.load %arg3[%c0_2, %c0_3] : memref<1x128xf32, #tpu.memory_space<vmem>>, vector<1x128xf32>
    %c0_4 = arith.constant 0 : index
    %c0_5 = arith.constant 0 : index
    %9 = vector.load %arg4[%c0_4, %c0_5] : memref<1x128xf32, #tpu.memory_space<vmem>>, vector<1x128xf32>
    %cst = arith.constant dense<0.000000e+00> : vector<8xf32>
    %10 = vector.multi_reduction <add>, %7, %cst [1] : vector<8x128xf32> to vector<8xf32>
    %11 = vector.shape_cast %10 : vector<8xf32> to vector<8x1xf32>
    %cst_6 = arith.constant 3.125000e-02 : f32
    %12 = vector.broadcast %cst_6 : f32 to vector<8x1xf32>
    %13 = arith.mulf %11, %12 : vector<8x1xf32>
    %14 = arith.mulf %7, %7 : vector<8x128xf32>
    %cst_7 = arith.constant dense<0.000000e+00> : vector<8xf32>
    %15 = vector.multi_reduction <add>, %14, %cst_7 [1] : vector<8x128xf32> to vector<8xf32>
    %16 = vector.shape_cast %15 : vector<8xf32> to vector<8x1xf32>
    %cst_8 = arith.constant 3.125000e-02 : f32
    %17 = vector.broadcast %cst_8 : f32 to vector<8x1xf32>
    %18 = arith.mulf %16, %17 : vector<8x1xf32>
    %19 = arith.mulf %13, %13 : vector<8x1xf32>
    %20 = arith.subf %18, %19 : vector<8x1xf32>
    %21 = vector.broadcast %13 : vector<8x1xf32> to vector<8x128xf32>
    %22 = arith.subf %7, %21 : vector<8x128xf32>
    %cst_9 = arith.constant 9.99999974E-6 : f32
    %23 = vector.broadcast %cst_9 : f32 to vector<8x1xf32>
    %24 = arith.addf %20, %23 : vector<8x1xf32>
    %25 = math.rsqrt %24 : vector<8x1xf32>
    %26 = vector.broadcast %25 : vector<8x1xf32> to vector<8x128xf32>
    %27 = arith.mulf %22, %26 : vector<8x128xf32>
    %28 = vector.broadcast %8 : vector<1x128xf32> to vector<8x128xf32>
    %29 = arith.mulf %27, %28 : vector<8x128xf32>
    %30 = vector.broadcast %9 : vector<1x128xf32> to vector<8x128xf32>
    %31 = arith.addf %29, %30 : vector<8x128xf32>
    %32 = arith.truncf %31 : vector<8x128xf32> to vector<8x128xbf16>
    %c0_10 = arith.constant 0 : index
    %c0_11 = arith.constant 0 : index
    %33 = vector.load %arg5[%c0_10, %c0_11] : memref<128x32xbf16, #tpu.memory_space<vmem>>, vector<128x32xbf16>
    %cst_12 = arith.constant dense<0.000000e+00> : vector<8x32xf32>
    %34 = tpu.matmul %32, %33, %cst_12 {dimension_numbers = #tpu.dot_dimension_numbers<[1], [0], [0], [1], [0, 0, 1, 1], [], []>} : vector<8x128xbf16>, vector<128x32xbf16>, vector<8x32xf32> -> vector<8x32xf32>
    %c0_13 = arith.constant 0 : index
    %c0_14 = arith.constant 0 : index
    %35 = vector.load %arg6[%c0_13, %c0_14] : memref<1x32xf32, #tpu.memory_space<vmem>>, vector<1x32xf32>
    %36 = vector.broadcast %35 : vector<1x32xf32> to vector<8x32xf32>
    %37 = arith.addf %34, %36 : vector<8x32xf32>
    %38 = arith.truncf %37 : vector<8x32xf32> to vector<8x32xbf16>
    %39 = vector.extract_strided_slice %38 {offsets = [0, 0], sizes = [8, 8], strides = [1, 1]} : vector<8x32xbf16> to vector<8x8xbf16>
    %c0_15 = arith.constant 0 : index
    %c0_16 = arith.constant 0 : index
    %c0_17 = arith.constant 0 : index
    %40 = vector.load %arg18[%c0_15, %c0_16, %c0_17] : memref<4x8x8xbf16, #tpu.memory_space<vmem>>, vector<1x8x8xbf16>
    %41 = vector.shape_cast %40 : vector<1x8x8xbf16> to vector<8x8xbf16>
    %cst_18 = arith.constant dense<0.000000e+00> : vector<8x8xf32>
    %42 = tpu.matmul %39, %41, %cst_18 {dimension_numbers = #tpu.dot_dimension_numbers<[1], [0], [0], [1], [0, 0, 1, 1], [], []>} : vector<8x8xbf16>, vector<8x8xbf16>, vector<8x8xf32> -> vector<8x8xf32>
    %cst_19 = arith.constant dense<0xFF800000> : vector<8xf32>
    %43 = vector.multi_reduction <maximumf>, %42, %cst_19 [1] : vector<8x8xf32> to vector<8xf32>
    %44 = vector.shape_cast %43 : vector<8xf32> to vector<8x1xf32>
    %45 = vector.broadcast %44 : vector<8x1xf32> to vector<8x8xf32>
    %46 = arith.subf %42, %45 : vector<8x8xf32>
    %47 = math.exp %46 : vector<8x8xf32>
    %cst_20 = arith.constant dense<0.000000e+00> : vector<8xf32>
    %48 = vector.multi_reduction <add>, %47, %cst_20 [1] : vector<8x8xf32> to vector<8xf32>
    %49 = vector.shape_cast %48 : vector<8xf32> to vector<8x1xf32>
    %50 = tpu.reciprocal %49 {approx = true} : vector<8x1xf32> -> vector<8x1xf32>
    %51 = vector.broadcast %50 : vector<8x1xf32> to vector<8x8xf32>
    %52 = arith.mulf %47, %51 : vector<8x8xf32>
    %53 = arith.truncf %52 : vector<8x8xf32> to vector<8x8xbf16>
    %c0_21 = arith.constant 0 : index
    %c0_22 = arith.constant 0 : index
    %c0_23 = arith.constant 0 : index
    %54 = vector.load %arg19[%c0_21, %c0_22, %c0_23] : memref<4x8x8xbf16, #tpu.memory_space<vmem>>, vector<1x8x8xbf16>
    %55 = vector.shape_cast %54 : vector<1x8x8xbf16> to vector<8x8xbf16>
    %cst_24 = arith.constant dense<0.000000e+00> : vector<8x8xf32>
    %56 = tpu.matmul %53, %55, %cst_24 {dimension_numbers = #tpu.dot_dimension_numbers<[1], [0], [0], [1], [0, 0, 1, 1], [], []>} : vector<8x8xbf16>, vector<8x8xbf16>, vector<8x8xf32> -> vector<8x8xf32>
    %57 = arith.truncf %56 : vector<8x8xf32> to vector<8x8xbf16>
    %c0_25 = arith.constant 0 : index
    %c0_26 = arith.constant 0 : index
    %58 = vector.load %arg20[%c0_25, %c0_26] : memref<8x32xbf16, #tpu.memory_space<vmem>>, vector<8x8xbf16>
    tpu.vector_store %arg20[%c0_25, %c0_26], %57 {strides = array<i32>} : memref<8x32xbf16, #tpu.memory_space<vmem>>, vector<8x8xbf16>,
    %59 = vector.extract_strided_slice %38 {offsets = [0, 8], sizes = [8, 8], strides = [1, 1]} : vector<8x32xbf16> to vector<8x8xbf16>
    %c1 = arith.constant 1 : index
    %c0_27 = arith.constant 0 : index
    %c0_28 = arith.constant 0 : index
    %60 = vector.load %arg18[%c1, %c0_27, %c0_28] : memref<4x8x8xbf16, #tpu.memory_space<vmem>>, vector<1x8x8xbf16>
    %61 = vector.shape_cast %60 : vector<1x8x8xbf16> to vector<8x8xbf16>
    %cst_29 = arith.constant dense<0.000000e+00> : vector<8x8xf32>
    %62 = tpu.matmul %59, %61, %cst_29 {dimension_numbers = #tpu.dot_dimension_numbers<[1], [0], [0], [1], [0, 0, 1, 1], [], []>} : vector<8x8xbf16>, vector<8x8xbf16>, vector<8x8xf32> -> vector<8x8xf32>
    %cst_30 = arith.constant dense<0xFF800000> : vector<8xf32>
    %63 = vector.multi_reduction <maximumf>, %62, %cst_30 [1] : vector<8x8xf32> to vector<8xf32>
    %64 = vector.shape_cast %63 : vector<8xf32> to vector<8x1xf32>
    %65 = vector.broadcast %64 : vector<8x1xf32> to vector<8x8xf32>
    %66 = arith.subf %62, %65 : vector<8x8xf32>
    %67 = math.exp %66 : vector<8x8xf32>
    %cst_31 = arith.constant dense<0.000000e+00> : vector<8xf32>
    %68 = vector.multi_reduction <add>, %67, %cst_31 [1] : vector<8x8xf32> to vector<8xf32>
    %69 = vector.shape_cast %68 : vector<8xf32> to vector<8x1xf32>
    %70 = tpu.reciprocal %69 {approx = true} : vector<8x1xf32> -> vector<8x1xf32>
    %71 = vector.broadcast %70 : vector<8x1xf32> to vector<8x8xf32>
    %72 = arith.mulf %67, %71 : vector<8x8xf32>
    %73 = arith.truncf %72 : vector<8x8xf32> to vector<8x8xbf16>
    %c1_32 = arith.constant 1 : index
    %c0_33 = arith.constant 0 : index
    %c0_34 = arith.constant 0 : index
    %74 = vector.load %arg19[%c1_32, %c0_33, %c0_34] : memref<4x8x8xbf16, #tpu.memory_space<vmem>>, vector<1x8x8xbf16>
    %75 = vector.shape_cast %74 : vector<1x8x8xbf16> to vector<8x8xbf16>
    %cst_35 = arith.constant dense<0.000000e+00> : vector<8x8xf32>
    %76 = tpu.matmul %73, %75, %cst_35 {dimension_numbers = #tpu.dot_dimension_numbers<[1], [0], [0], [1], [0, 0, 1, 1], [], []>} : vector<8x8xbf16>, vector<8x8xbf16>, vector<8x8xf32> -> vector<8x8xf32>
    %77 = arith.truncf %76 : vector<8x8xf32> to vector<8x8xbf16>
    %c0_36 = arith.constant 0 : index
    %c8 = arith.constant 8 : index
    %78 = vector.load %arg20[%c0_36, %c8] : memref<8x32xbf16, #tpu.memory_space<vmem>>, vector<8x8xbf16>
    tpu.vector_store %arg20[%c0_36, %c8], %77 {strides = array<i32>} : memref<8x32xbf16, #tpu.memory_space<vmem>>, vector<8x8xbf16>,
    %79 = vector.extract_strided_slice %38 {offsets = [0, 16], sizes = [8, 8], strides = [1, 1]} : vector<8x32xbf16> to vector<8x8xbf16>
    %c2 = arith.constant 2 : index
    %c0_37 = arith.constant 0 : index
    %c0_38 = arith.constant 0 : index
    %80 = vector.load %arg18[%c2, %c0_37, %c0_38] : memref<4x8x8xbf16, #tpu.memory_space<vmem>>, vector<1x8x8xbf16>
    %81 = vector.shape_cast %80 : vector<1x8x8xbf16> to vector<8x8xbf16>
    %cst_39 = arith.constant dense<0.000000e+00> : vector<8x8xf32>
    %82 = tpu.matmul %79, %81, %cst_39 {dimension_numbers = #tpu.dot_dimension_numbers<[1], [0], [0], [1], [0, 0, 1, 1], [], []>} : vector<8x8xbf16>, vector<8x8xbf16>, vector<8x8xf32> -> vector<8x8xf32>
    %cst_40 = arith.constant dense<0xFF800000> : vector<8xf32>
    %83 = vector.multi_reduction <maximumf>, %82, %cst_40 [1] : vector<8x8xf32> to vector<8xf32>
    %84 = vector.shape_cast %83 : vector<8xf32> to vector<8x1xf32>
    %85 = vector.broadcast %84 : vector<8x1xf32> to vector<8x8xf32>
    %86 = arith.subf %82, %85 : vector<8x8xf32>
    %87 = math.exp %86 : vector<8x8xf32>
    %cst_41 = arith.constant dense<0.000000e+00> : vector<8xf32>
    %88 = vector.multi_reduction <add>, %87, %cst_41 [1] : vector<8x8xf32> to vector<8xf32>
    %89 = vector.shape_cast %88 : vector<8xf32> to vector<8x1xf32>
    %90 = tpu.reciprocal %89 {approx = true} : vector<8x1xf32> -> vector<8x1xf32>
    %91 = vector.broadcast %90 : vector<8x1xf32> to vector<8x8xf32>
    %92 = arith.mulf %87, %91 : vector<8x8xf32>
    %93 = arith.truncf %92 : vector<8x8xf32> to vector<8x8xbf16>
    %c2_42 = arith.constant 2 : index
    %c0_43 = arith.constant 0 : index
    %c0_44 = arith.constant 0 : index
    %94 = vector.load %arg19[%c2_42, %c0_43, %c0_44] : memref<4x8x8xbf16, #tpu.memory_space<vmem>>, vector<1x8x8xbf16>
    %95 = vector.shape_cast %94 : vector<1x8x8xbf16> to vector<8x8xbf16>
    %cst_45 = arith.constant dense<0.000000e+00> : vector<8x8xf32>
    %96 = tpu.matmul %93, %95, %cst_45 {dimension_numbers = #tpu.dot_dimension_numbers<[1], [0], [0], [1], [0, 0, 1, 1], [], []>} : vector<8x8xbf16>, vector<8x8xbf16>, vector<8x8xf32> -> vector<8x8xf32>
    %97 = arith.truncf %96 : vector<8x8xf32> to vector<8x8xbf16>
    %c0_46 = arith.constant 0 : index
    %c16 = arith.constant 16 : index
    %98 = vector.load %arg20[%c0_46, %c16] : memref<8x32xbf16, #tpu.memory_space<vmem>>, vector<8x8xbf16>
    tpu.vector_store %arg20[%c0_46, %c16], %97 {strides = array<i32>} : memref<8x32xbf16, #tpu.memory_space<vmem>>, vector<8x8xbf16>,
    %99 = vector.extract_strided_slice %38 {offsets = [0, 24], sizes = [8, 8], strides = [1, 1]} : vector<8x32xbf16> to vector<8x8xbf16>
    %c3 = arith.constant 3 : index
    %c0_47 = arith.constant 0 : index
    %c0_48 = arith.constant 0 : index
    %100 = vector.load %arg18[%c3, %c0_47, %c0_48] : memref<4x8x8xbf16, #tpu.memory_space<vmem>>, vector<1x8x8xbf16>
    %101 = vector.shape_cast %100 : vector<1x8x8xbf16> to vector<8x8xbf16>
    %cst_49 = arith.constant dense<0.000000e+00> : vector<8x8xf32>
    %102 = tpu.matmul %99, %101, %cst_49 {dimension_numbers = #tpu.dot_dimension_numbers<[1], [0], [0], [1], [0, 0, 1, 1], [], []>} : vector<8x8xbf16>, vector<8x8xbf16>, vector<8x8xf32> -> vector<8x8xf32>
    %cst_50 = arith.constant dense<0xFF800000> : vector<8xf32>
    %103 = vector.multi_reduction <maximumf>, %102, %cst_50 [1] : vector<8x8xf32> to vector<8xf32>
    %104 = vector.shape_cast %103 : vector<8xf32> to vector<8x1xf32>
    %105 = vector.broadcast %104 : vector<8x1xf32> to vector<8x8xf32>
    %106 = arith.subf %102, %105 : vector<8x8xf32>
    %107 = math.exp %106 : vector<8x8xf32>
    %cst_51 = arith.constant dense<0.000000e+00> : vector<8xf32>
    %108 = vector.multi_reduction <add>, %107, %cst_51 [1] : vector<8x8xf32> to vector<8xf32>
    %109 = vector.shape_cast %108 : vector<8xf32> to vector<8x1xf32>
    %110 = tpu.reciprocal %109 {approx = true} : vector<8x1xf32> -> vector<8x1xf32>
    %111 = vector.broadcast %110 : vector<8x1xf32> to vector<8x8xf32>
    %112 = arith.mulf %107, %111 : vector<8x8xf32>
    %113 = arith.truncf %112 : vector<8x8xf32> to vector<8x8xbf16>
    %c3_52 = arith.constant 3 : index
    %c0_53 = arith.constant 0 : index
    %c0_54 = arith.constant 0 : index
    %114 = vector.load %arg19[%c3_52, %c0_53, %c0_54] : memref<4x8x8xbf16, #tpu.memory_space<vmem>>, vector<1x8x8xbf16>
    %115 = vector.shape_cast %114 : vector<1x8x8xbf16> to vector<8x8xbf16>
    %cst_55 = arith.constant dense<0.000000e+00> : vector<8x8xf32>
    %116 = tpu.matmul %113, %115, %cst_55 {dimension_numbers = #tpu.dot_dimension_numbers<[1], [0], [0], [1], [0, 0, 1, 1], [], []>} : vector<8x8xbf16>, vector<8x8xbf16>, vector<8x8xf32> -> vector<8x8xf32>
    %117 = arith.truncf %116 : vector<8x8xf32> to vector<8x8xbf16>
    %c0_56 = arith.constant 0 : index
    %c24 = arith.constant 24 : index
    %118 = vector.load %arg20[%c0_56, %c24] : memref<8x32xbf16, #tpu.memory_space<vmem>>, vector<8x8xbf16>
    tpu.vector_store %arg20[%c0_56, %c24], %117 {strides = array<i32>} : memref<8x32xbf16, #tpu.memory_space<vmem>>, vector<8x8xbf16>,
    %c0_57 = arith.constant 0 : index
    %c0_58 = arith.constant 0 : index
    %119 = vector.load %arg20[%c0_57, %c0_58] : memref<8x32xbf16, #tpu.memory_space<vmem>>, vector<8x32xbf16>
    %c0_59 = arith.constant 0 : index
    %c0_60 = arith.constant 0 : index
    %120 = vector.load %arg9[%c0_59, %c0_60] : memref<32x128xbf16, #tpu.memory_space<vmem>>, vector<32x128xbf16>
    %cst_61 = arith.constant dense<0.000000e+00> : vector<8x128xf32>
    %121 = tpu.matmul %119, %120, %cst_61 {dimension_numbers = #tpu.dot_dimension_numbers<[1], [0], [0], [1], [0, 0, 1, 1], [], []>} : vector<8x32xbf16>, vector<32x128xbf16>, vector<8x128xf32> -> vector<8x128xf32>
    %c0_62 = arith.constant 0 : index
    %c0_63 = arith.constant 0 : index
    %122 = vector.load %arg10[%c0_62, %c0_63] : memref<1x128xf32, #tpu.memory_space<vmem>>, vector<1x128xf32>
    %123 = vector.broadcast %122 : vector<1x128xf32> to vector<8x128xf32>
    %124 = arith.addf %121, %123 : vector<8x128xf32>
    %125 = arith.addf %7, %124 : vector<8x128xf32>
    %c0_64 = arith.constant 0 : index
    %c0_65 = arith.constant 0 : index
    %126 = vector.load %arg11[%c0_64, %c0_65] : memref<1x128xf32, #tpu.memory_space<vmem>>, vector<1x128xf32>
    %c0_66 = arith.constant 0 : index
    %c0_67 = arith.constant 0 : index
    %127 = vector.load %arg12[%c0_66, %c0_67] : memref<1x128xf32, #tpu.memory_space<vmem>>, vector<1x128xf32>
    %cst_68 = arith.constant dense<0.000000e+00> : vector<8xf32>
    %128 = vector.multi_reduction <add>, %125, %cst_68 [1] : vector<8x128xf32> to vector<8xf32>
    %129 = vector.shape_cast %128 : vector<8xf32> to vector<8x1xf32>
    %cst_69 = arith.constant 3.125000e-02 : f32
    %130 = vector.broadcast %cst_69 : f32 to vector<8x1xf32>
    %131 = arith.mulf %129, %130 : vector<8x1xf32>
    %132 = arith.mulf %125, %125 : vector<8x128xf32>
    %cst_70 = arith.constant dense<0.000000e+00> : vector<8xf32>
    %133 = vector.multi_reduction <add>, %132, %cst_70 [1] : vector<8x128xf32> to vector<8xf32>
    %134 = vector.shape_cast %133 : vector<8xf32> to vector<8x1xf32>
    %cst_71 = arith.constant 3.125000e-02 : f32
    %135 = vector.broadcast %cst_71 : f32 to vector<8x1xf32>
    %136 = arith.mulf %134, %135 : vector<8x1xf32>
    %137 = arith.mulf %131, %131 : vector<8x1xf32>
    %138 = arith.subf %136, %137 : vector<8x1xf32>
    %139 = vector.broadcast %131 : vector<8x1xf32> to vector<8x128xf32>
    %140 = arith.subf %125, %139 : vector<8x128xf32>
    %cst_72 = arith.constant 9.99999974E-6 : f32
    %141 = vector.broadcast %cst_72 : f32 to vector<8x1xf32>
    %142 = arith.addf %138, %141 : vector<8x1xf32>
    %143 = math.rsqrt %142 : vector<8x1xf32>
    %144 = vector.broadcast %143 : vector<8x1xf32> to vector<8x128xf32>
    %145 = arith.mulf %140, %144 : vector<8x128xf32>
    %146 = vector.broadcast %126 : vector<1x128xf32> to vector<8x128xf32>
    %147 = arith.mulf %145, %146 : vector<8x128xf32>
    %148 = vector.broadcast %127 : vector<1x128xf32> to vector<8x128xf32>
    %149 = arith.addf %147, %148 : vector<8x128xf32>
    %150 = arith.truncf %149 : vector<8x128xf32> to vector<8x128xbf16>
    %c0_73 = arith.constant 0 : index
    %c0_74 = arith.constant 0 : index
    %151 = vector.load %arg13[%c0_73, %c0_74] : memref<128x128xbf16, #tpu.memory_space<vmem>>, vector<128x128xbf16>
    %cst_75 = arith.constant dense<0.000000e+00> : vector<8x128xf32>
    %152 = tpu.matmul %150, %151, %cst_75 {dimension_numbers = #tpu.dot_dimension_numbers<[1], [0], [0], [1], [0, 0, 1, 1], [], []>} : vector<8x128xbf16>, vector<128x128xbf16>, vector<8x128xf32> -> vector<8x128xf32>
    %c0_76 = arith.constant 0 : index
    %c0_77 = arith.constant 0 : index
    %153 = vector.load %arg14[%c0_76, %c0_77] : memref<1x128xf32, #tpu.memory_space<vmem>>, vector<1x128xf32>
    %154 = vector.broadcast %153 : vector<1x128xf32> to vector<8x128xf32>
    %155 = arith.addf %152, %154 : vector<8x128xf32>
    %cst_78 = arith.constant 5.000000e-01 : f32
    %156 = vector.broadcast %cst_78 : f32 to vector<8x128xf32>
    %157 = arith.mulf %156, %155 : vector<8x128xf32>
    %cst_79 = arith.constant 4.471500e-02 : f32
    %158 = vector.broadcast %cst_79 : f32 to vector<8x128xf32>
    %159 = arith.mulf %158, %155 : vector<8x128xf32>
    %160 = arith.mulf %159, %155 : vector<8x128xf32>
    %161 = arith.mulf %160, %155 : vector<8x128xf32>
    %162 = arith.addf %155, %161 : vector<8x128xf32>
    %cst_80 = arith.constant 0.797884583 : f32
    %163 = vector.broadcast %cst_80 : f32 to vector<8x128xf32>
    %164 = arith.mulf %163, %162 : vector<8x128xf32>
    %165 = math.tanh %164 : vector<8x128xf32>
    %cst_81 = arith.constant 1.000000e+00 : f32
    %166 = vector.broadcast %cst_81 : f32 to vector<8x128xf32>
    %167 = arith.addf %166, %165 : vector<8x128xf32>
    %168 = arith.mulf %157, %167 : vector<8x128xf32>
    %169 = arith.truncf %168 : vector<8x128xf32> to vector<8x128xbf16>
    %c0_82 = arith.constant 0 : index
    %c0_83 = arith.constant 0 : index
    %170 = vector.load %arg15[%c0_82, %c0_83] : memref<128x128xbf16, #tpu.memory_space<vmem>>, vector<128x128xbf16>
    %cst_84 = arith.constant dense<0.000000e+00> : vector<8x128xf32>
    %171 = tpu.matmul %169, %170, %cst_84 {dimension_numbers = #tpu.dot_dimension_numbers<[1], [0], [0], [1], [0, 0, 1, 1], [], []>} : vector<8x128xbf16>, vector<128x128xbf16>, vector<8x128xf32> -> vector<8x128xf32>
    %c0_85 = arith.constant 0 : index
    %c0_86 = arith.constant 0 : index
    %172 = vector.load %arg16[%c0_85, %c0_86] : memref<1x128xf32, #tpu.memory_space<vmem>>, vector<1x128xf32>
    %173 = vector.broadcast %172 : vector<1x128xf32> to vector<8x128xf32>
    %174 = arith.addf %171, %173 : vector<8x128xf32>
    %175 = arith.addf %125, %174 : vector<8x128xf32>
    %c0_87 = arith.constant 0 : index
    %c0_88 = arith.constant 0 : index
    %c0_89 = arith.constant 0 : index
    %176 = vector.load %arg17[%c0_87, %c0_88, %c0_89] : memref<1x8x128xf32, #tpu.memory_space<vmem>>, vector<1x8x128xf32>
    %177 = vector.shape_cast %176 : vector<1x8x128xf32> to vector<8x128xf32>
    %178 = vector.shape_cast %175 : vector<8x128xf32> to vector<1x8x128xf32>
    tpu.vector_store %arg17[%c0_87, %c0_88, %c0_89], %178 {strides = array<i32>} : memref<1x8x128xf32, #tpu.memory_space<vmem>>, vector<1x8x128xf32>,
    return
  }
  func.func @transform_0(%arg0: i32, %arg1: i32) -> (i32, i32, i32) {
    %c0_i32 = arith.constant 0 : i32
    %c0_i32_0 = arith.constant 0 : i32
    %c0_i32_1 = arith.constant 0 : i32
    return %arg0, %c0_i32, %c0_i32_0 : i32, i32, i32
  }
  func.func @transform_1(%arg0: i32, %arg1: i32) -> (i32, i32) {
    %c0_i32 = arith.constant 0 : i32
    %c0_i32_0 = arith.constant 0 : i32
    %c0_i32_1 = arith.constant 0 : i32
    return %c0_i32, %c0_i32_0 : i32, i32
  }
  func.func @transform_2(%arg0: i32, %arg1: i32) -> (i32, i32) {
    %c0_i32 = arith.constant 0 : i32
    %c0_i32_0 = arith.constant 0 : i32
    %c0_i32_1 = arith.constant 0 : i32
    return %c0_i32, %c0_i32_0 : i32, i32
  }
  func.func @transform_3(%arg0: i32, %arg1: i32) -> (i32, i32) {
    %c0_i32 = arith.constant 0 : i32
    %c0_i32_0 = arith.constant 0 : i32
    %c0_i32_1 = arith.constant 0 : i32
    return %c0_i32, %c0_i32_0 : i32, i32
  }
  func.func @transform_4(%arg0: i32, %arg1: i32) -> (i32, i32) {
    %c0_i32 = arith.constant 0 : i32
    %c0_i32_0 = arith.constant 0 : i32
    %c0_i32_1 = arith.constant 0 : i32
    return %c0_i32, %c0_i32_0 : i32, i32
  }
  func.func @transform_5(%arg0: i32, %arg1: i32) -> (i32, i32) {
    %c0_i32 = arith.constant 0 : i32
    %c0_i32_0 = arith.constant 0 : i32
    %c0_i32_1 = arith.constant 0 : i32
    return %c0_i32, %c0_i32_0 : i32, i32
  }
  func.func @transform_6(%arg0: i32, %arg1: i32) -> (i32, i32) {
    %c0_i32 = arith.constant 0 : i32
    %c0_i32_0 = arith.constant 0 : i32
    %c0_i32_1 = arith.constant 0 : i32
    return %c0_i32, %c0_i32_0 : i32, i32
  }
  func.func @transform_7(%arg0: i32, %arg1: i32) -> (i32, i32) {
    %c0_i32 = arith.constant 0 : i32
    %c0_i32_0 = arith.constant 0 : i32
    %c0_i32_1 = arith.constant 0 : i32
    return %c0_i32, %c0_i32_0 : i32, i32
  }
  func.func @transform_8(%arg0: i32, %arg1: i32) -> (i32, i32) {
    %c0_i32 = arith.constant 0 : i32
    %c0_i32_0 = arith.constant 0 : i32
    %c0_i32_1 = arith.constant 0 : i32
    return %c0_i32, %c0_i32_0 : i32, i32
  }
  func.func @transform_9(%arg0: i32, %arg1: i32) -> (i32, i32) {
    %c0_i32 = arith.constant 0 : i32
    %c0_i32_0 = arith.constant 0 : i32
    %c0_i32_1 = arith.constant 0 : i32
    return %c0_i32, %c0_i32_0 : i32, i32
  }
  func.func @transform_10(%arg0: i32, %arg1: i32) -> (i32, i32) {
    %c0_i32 = arith.constant 0 : i32
    %c0_i32_0 = arith.constant 0 : i32
    %c0_i32_1 = arith.constant 0 : i32
    return %c0_i32, %c0_i32_0 : i32, i32
  }
  func.func @transform_11(%arg0: i32, %arg1: i32) -> (i32, i32) {
    %c0_i32 = arith.constant 0 : i32
    %c0_i32_0 = arith.constant 0 : i32
    %c0_i32_1 = arith.constant 0 : i32
    return %c0_i32, %c0_i32_0 : i32, i32
  }
  func.func @transform_12(%arg0: i32, %arg1: i32) -> (i32, i32) {
    %c0_i32 = arith.constant 0 : i32
    %c0_i32_0 = arith.constant 0 : i32
    %c0_i32_1 = arith.constant 0 : i32
    return %c0_i32, %c0_i32_0 : i32, i32
  }
  func.func @transform_13(%arg0: i32, %arg1: i32) -> (i32, i32) {
    %c0_i32 = arith.constant 0 : i32
    %c0_i32_0 = arith.constant 0 : i32
    %c0_i32_1 = arith.constant 0 : i32
    return %c0_i32, %c0_i32_0 : i32, i32
  }
  func.func @transform_14(%arg0: i32, %arg1: i32) -> (i32, i32) {
    %c0_i32 = arith.constant 0 : i32
    %c0_i32_0 = arith.constant 0 : i32
    %c0_i32_1 = arith.constant 0 : i32
    return %c0_i32, %c0_i32_0 : i32, i32
  }
  func.func @transform_15(%arg0: i32, %arg1: i32) -> (i32, i32, i32) {
    %c0_i32 = arith.constant 0 : i32
    %c0_i32_0 = arith.constant 0 : i32
    return %arg0, %arg1, %c0_i32 : i32, i32, i32
  }
}

</mosaic_0001>

<bundles_post_ra>
// kernel: tpu_custom_call.1
= control target key start
LH: loop header
LB: loop body
LE: loop exit
PB: predicated region body
PF: predicated region fallthrough
CT: control target
= control target key end

     0   :  { %20 = vsyncpa [#allocation6], 0  ;;  %s2774_s0 = inlined_call_operand.vmem [shape: f32[2,8,128], index: 0, kind: input, shape index: {}]   ;;  %s2775_s1 = inlined_call_operand.vmem [shape: f32[1,128], index: 1, kind: input, shape index: {}]   ;;  %s2776_s2 = inlined_call_operand.vmem [shape: f32[1,128], index: 2, kind: input, shape index: {}]   ;;  %s2777_s3 = inlined_call_operand.vmem [shape: bf16[128,32], index: 3, kind: input, shape index: {}]   ;;  %s2778_s4 = inlined_call_operand.hbm [shape: f32[1,32], index: 4, kind: input, shape index: {}]   ;;  %s2779_s5 = inlined_call_operand.vmem [shape: bf16[128,64], index: 5, kind: input, shape index: {}]   ;;  %s2780_s6 = inlined_call_operand.vmem [shape: f32[1,64], index: 6, kind: input, shape index: {}]   ;;  %s2781_s7 = inlined_call_operand.vmem [shape: bf16[32,128], index: 7, kind: input, shape index: {}]   ;;  %s2782_s8 = inlined_call_operand.vmem [shape: f32[1,128], index: 8, kind: input, shape index: {}]   ;;  %s2783_s9 = inlined_call_operand.vmem [shape: f32[1,128], index: 9, kind: input, shape index: {}]   ;;  %s2784_s10 = inlined_call_operand.vmem [shape: f32[1,128], index: 10, kind: input, shape index: {}]   ;;  %s2785_s11 = inlined_call_operand.vmem [shape: bf16[128,128], index: 11, kind: input, shape index: {}]   ;;  %s2786_s12 = inlined_call_operand.vmem [shape: f32[1,128], index: 12, kind: input, shape index: {}]   ;;  %s2787_s13 = inlined_call_operand.vmem [shape: bf16[128,128], index: 13, kind: input, shape index: {}]   ;;  %s2788_s14 = inlined_call_operand.vmem [shape: f32[1,128], index: 14, kind: input, shape index: {}]   ;;  %s2789_s15 = inlined_call_operand.hbm [shape: f32[2,8,128], index: 15, kind: output, shape index: {}]  }
   0x1   :  { %21 = vsyncpa [#allocation7], 0 }
   0x2   :  { %23 = vsyncpa [#allocation7 + $0x1], 0  ;;  %s2374_s18 = smov 0   ;;  %s2376_s19 = smov 0  }
   0x3   :  { %s2378_s20 = smov 0   ;;  %s2380_s21 = smov 0  }
   0x4   :  { %s2382_s22 = smov 0   ;;  %s2384_s23 = smov 0  }
   0x5 LB: > { %2801 = sst [smem:[#allocation11_spill]] %s2258_s18  ;;  %s1763_s24 = sadd.s32 4294967295, %s2278_s23   ;;  %s2278_s23 = sphi %s2384_s23, %s29_s23   ;;  %s2274_s22 = sphi %s2382_s22, %s2823_s22   ;;  %s2270_s21 = sphi %s2380_s21, %s2822_s21   ;;  %s2266_s20 = sphi %s2378_s20, %s2821_s20   ;;  %s2262_s19 = sphi %s2376_s19, %s2825_s19   ;;  %s2258_s18 = sphi %s2374_s18, %s2824_s18  }
   0x6   : > { %2802 = sst [smem:[#allocation12_spill]] %s2266_s20  ;;  %s1764_s25 = sadd.s32 4294967294, %s2278_s23  }
   0x7   : > { %2803 = sst [smem:[#allocation13_spill]] %s2274_s22  ;;  %s41_s26 = sadd.s32 1, %s2274_s22 }
   0x8   : > { %2804 = sst [smem:[#allocation14_spill]] %s2278_s23  ;;  %s370_s27 = sadd.s32 1, %s2266_s20 }
   0x9   : > { %p43_p0 = scmp.ge.s32.totalorder %s41_s26, 2  ;;  %p380_p1 = scmp.ne.s32.totalorder %s2266_s20, %s2262_s19 }
   0xa   : > { %p381_p2 = scmp.eq.s32.totalorder %s1763_s24, 1  ;;  %p386_p3 = scmp.ne.s32.totalorder %s2262_s19, %s2258_s18 }
   0xb   : > { %s2827_s26 = smov (%p43_p0, %s41_s26), 0  ;;  %p387_p5 = scmp.eq.s32.totalorder %s1764_s25, 1 }
   0xc   : > { %2805 = sst [smem:[#allocation15_spill]] %s2827_s26  ;;  %p2414_p4 = por %p381_p2, %p380_p1 }
   0xd   : > { %s365_s29 = ssub.s32 %s2274_s22, %s2827_s26  ;;  %p1765_p6 = scmp.ge.s32.totalorder %s2278_s23, 1 }
   0xe   : > { %s2806_s28 = scalar_select %p2414_p4, 1, 0 }
   0xf   : > { %p368_p7 = scmp.eq.s32.totalorder %s365_s29, 0  ;;  %p2421_p8 = por %p387_p5, %p386_p3 }
  0x10   : > { %p394_p9 = scmp.lt.s32.totalorder %s2278_s23, 3  ;;  %p2433_p11 = scmp.eq.s32.totalorder %s1763_s24, 0 }
  0x11   : > { %s2807_s30 = scalar_select %p2421_p8, 1, 0 }
  0x12   : > { %s2427_s16 = scalar_select %p368_p7, %s2266_s20, %s370_s27  }
  0x13   : > { %2808 = sst [smem:[#allocation16_spill]] %s2807_s30  ;;  %p2429_p10 = pnand %p1765_p6, %p394_p9 }
  0x14   : > { %2809 = sst [smem:[#allocation17_spill]] %s2427_s16  ;;  %s2280_s25 = smov [#allocation5]  }
  0x15   : > { %s2810_s17 = scalar_select %p2429_p10, 1, 0 }
  0x16   : > { %s2811_s18 = scalar_select %p2433_p11, 1, 0 }
  0x17   : > { %p2037_p12 = pneg %p2429_p10  ;;  %s416_s29 = sshll.u32 %s2280_s25, 4  ;;  %s417_s29 = int_to_ptr.vmem [resolvable:$true] %s416_s29 }
  0x18   : > { %s2168_s16 = scalar_lea.hbm %s2778_s4, 16 }
  0x19   : > { %p2441_p13 = pnand %p2433_p11, %p2037_p12  ;;  %p2169_p0 = scmp.ne.s32.totalorder %s2778_s4, %s2168_s16 }
  0x1a   : > { %p2175_p5 = scmp.lt.u32.totalorder %s2168_s16, %s2778_s4 }
  0x1b   : > { %p2170_p1 = pneg %p2441_p13 }
  0x1d   : > { %p2171_p2 = pnand %p2170_p1, %p2169_p0 }
  0x1f   : > { %p2172_p3 = pneg %p2171_p2 }
  0x21   : > { %p2177_p6 = pnand %p2175_p5, %p2172_p3 }
  0x23   : > { %2180 = shalt.err (!%p2177_p6)
}
  0x24   : > { %s2181_s23 = scalar_lea.vmem %s417_s29, 16  ;;  %s2188_s22 = scalar_lea.vmem %s417_s29, 32 }
  0x25   : > { %p2182_p7 = scmp.ne.s32.totalorder %s417_s29, %s2181_s23  ;;  %p2189_p8 = scmp.lt.s32.totalorder %s417_s29, %s417_s29 }
  0x26   : > { %p2190_p4 = scmp.lt.s32.totalorder %s2188_s22, %s2181_s23 }
  0x27   : > { %p2184_p9 = pnand %p2182_p7, %p2170_p1 }
  0x28   : > { %p2191_p11 = por %p2190_p4, %p2189_p8 }
  0x29   : > { %p2185_p12 = pneg %p2184_p9 }
  0x2b   : > { %p2192_p10 = pnand %p2191_p11, %p2185_p12 }
  0x2d   : > { %2195 = shalt.err (!%p2192_p10)
}
  0x2e   : > { %2040 = dma.hbm_to_vmem [thread:$0]  (!%p2441_p13), %s2778_s4, 16, %s417_s29, [#allocation6]  }
  0x2f   : > { %p2813_p0 = scmp.ne.s32.totalorder %s2810_s17, 0 }
  0x30   : > { %p2814_p2 = scmp.ne.s32.totalorder (!%p2813_p0), %s2811_s18, 0 }
  0x31   : > { %466 = sbr.rel (%p2813_p0) target bundleno = 2310 (0x906), region = 80 }
  0x38   : > { %2249 = dma.done.wait (%p2814_p2), [#allocation6], 16  }
  0x39   : > { %2251 = vsyncadd (%p2814_p2), [#allocation6], 4294967280  ;;  %p513_p4 = scmp.lt.s32.totalorder %s2270_s21, 1  ;;  %v2281_v0 = vmov 0.0   ;;  %v2110_v3 = vld [vmem:[%s2779_s5] sm:$0xff]   ;;  %v2111_v4 = vld [vmem:[%s2779_s5 + $0x8] sm:$0xff]  }
  0x3a   : > { %1895 = vmatprep.subr.bf16.mxu0 %v2281_v0  ;;  %1915 = vmatprep.subr.bf16.mxu1 %v2281_v0  ;;  %v2112_v5 = vld [vmem:[%s2777_s3] sm:$0xff]   ;;  %v2113_v6 = vld [vmem:[%s2779_s5 + $0x10] sm:$0xff]   ;;  %v2114_v7 = vld [vmem:[%s2777_s3 + $0x8] sm:$0xff]   ;;  %vm2282_vm0 = vmmov 0   ;;  %s2283_s24 = smov 120   ;;  %s2284_s25 = smov 112  }
  0x3b   : > { %s514_s23 = scalar_select %p513_p4, %s2270_s21, 1  ;;  %1896 = vmatpush3.bf16.msra.mxu0 %v2110_v3  ;;  %1916 = vmatpush3.bf16.msra.mxu1 %v2112_v5  ;;  %v2115_v8 = vld [vmem:[%s2779_s5 + $0x18] sm:$0xff]   ;;  %v2116_v9 = vld [vmem:[%s2777_s3 + $0x10] sm:$0xff]   ;;  %v2117_v10 = vld [vmem:[%s2779_s5 + $0x20] sm:$0xff]   ;;  %vm681_vm1 = vcmask 60416   ;;  %vm869_vm2 = vcmask 1043456  }
  0x3c   : > { %1897 = vmatprep.subr.bf16.mxu0 %v2281_v0  ;;  %1917 = vmatprep.subr.bf16.mxu1 %v2281_v0  ;;  %v2118_v11 = vld [vmem:[%s2777_s3 + $0x18] sm:$0xff]   ;;  %v2119_v12 = vld [vmem:[%s2779_s5 + $0x28] sm:$0xff]   ;;  %v2120_v13 = vld [vmem:[%s2777_s3 + $0x20] sm:$0xff]   ;;  %s2285_s22 = smov 104   ;;  %vm865_vm3 = vcmask 64512   ;;  %s2286_s20 = smov 88  }
  0x3d   : > { %s1771_s26 = sshll.u32 %s514_s23, 3  ;;  %1911 = vmatprep.mubr.msk.bf16.mxu0 %vm2282_vm0, %v2281_v0  ;;  %1931 = vmatprep.mubr.msk.bf16.mxu1 %vm2282_vm0, %v2281_v0  ;;  %v2121_v14 = vld [vmem:[%s2779_s5 + $0x30] sm:$0xff]   ;;  %v2122_v15 = vld [vmem:[%s2777_s3 + $0x28] sm:$0xff]   ;;  %v2123_v16 = vld [vmem:[%s2779_s5 + $0x38] sm:$0xff]   ;;  %s2287_s27 = smov 96   ;;  %vm1093_vm4 = vcmask 126016  }
  0x3e   : > { %s516_s17 = scalar_lea.vmem %s2774_s0, %s1771_s26  ;;  %v2124_v17 = vld [vmem:[%s2777_s3 + $0x30] sm:$0xff]   ;;  %v2125_v18 = vld [vmem:[%s2777_s3 + $0x38] sm:$0xff]   ;;  %v1772_v35 = vld [vmem:[%s2775_s1] ss:$0 sm:$0xff]  ;;  %s2288_s23 = smov 80   ;;  %vm1212_vm5 = vcmask 191616  }
  0x3f   : > { %v2474_v1 = vld [vmem:[%s516_s17] sm:$0xff]  ;;  %1898 = vmatpush3.bf16.msra.mxu0 %v2111_v4  ;;  %1918 = vmatpush3.bf16.msra.mxu1 %v2114_v7  ;;  %s2289_s26 = smov 72   ;;  %s2290_s30 = smov 8   ;;  %vm1331_vm6 = vcmask 257216   ;;  %vm1357_vm7 = vcmask 261120  }
  0x40   : > { %525 = vadd.xlane.f32.xlu0 %v2474_v1  ;;  %v528_v2 = vmul.f32 %v2474_v1, %v2474_v1  ;;  %1899 = vmatprep.subr.bf16.mxu0 %v2281_v0  ;;  %v1773_v37 = vld [vmem:[%s2776_s2] ss:$0 sm:$0xff]  ;;  %v1788_v52 = vld [vmem:[#allocation5] ss:$0 sm:$0xff]  ;;  %s1833_s18 = sshll.u32 %s2270_s21, 7  ;;  %p2815_p10 = scmp.ne.s32.totalorder %s2806_s28, 0 }
  0x41   : > { %1919 = vmatprep.subr.bf16.mxu1 %v2281_v0  ;;  %v1774_v47 = vld [vmem:[%s2780_s6] ss:$0 sm:$0xff] }
  0x42   : > { %529 = vadd.xlane.f32.xlu1 %v528_v2 }
  0x43   : > { %1900 = vmatpush3.bf16.msra.mxu0 %v2113_v6  ;;  %1920 = vmatpush3.bf16.msra.mxu1 %v2116_v9 }
  0x44   : > { %724 = vadd.xlane.f32.xlu0 %v2474_v1  ;;  %1901 = vmatprep.subr.bf16.mxu0 %v2281_v0 }
  0x45   : > { %1921 = vmatprep.subr.bf16.mxu1 %v2281_v0 }
  0x46   : > { %728 = vadd.xlane.f32.xlu1 %v528_v2 }
  0x47   : > { %1902 = vmatpush3.bf16.msra.mxu0 %v2115_v8  ;;  %1922 = vmatpush3.bf16.msra.mxu1 %v2118_v11 }
  0x48   : > { %1903 = vmatprep.subr.bf16.mxu0 %v2281_v0  ;;  %1923 = vmatprep.subr.bf16.mxu1 %v2281_v0 }
  0x4b   : > { %1904 = vmatpush3.bf16.msra.mxu0 %v2117_v10  ;;  %1924 = vmatpush3.bf16.msra.mxu1 %v2120_v13 }
  0x4c   : > { %1905 = vmatprep.subr.bf16.mxu0 %v2281_v0  ;;  %1925 = vmatprep.subr.bf16.mxu1 %v2281_v0 }
  0x4f   : > { %1906 = vmatpush3.bf16.msra.mxu0 %v2119_v12  ;;  %1926 = vmatpush3.bf16.msra.mxu1 %v2122_v15 }
  0x50   : > { %1907 = vmatprep.subr.bf16.mxu0 %v2281_v0  ;;  %1927 = vmatprep.subr.bf16.mxu1 %v2281_v0 }
  0x53   : > { %1908 = vmatpush3.bf16.msra.mxu0 %v2121_v14  ;;  %1928 = vmatpush3.bf16.msra.mxu1 %v2124_v17 }
  0x54   : > { %1909 = vmatprep.subr.bf16.mxu0 %v2281_v0  ;;  %1929 = vmatprep.subr.bf16.mxu1 %v2281_v0 }
  0x57   : > { %1910 = vmatpush3.bf16.msra.mxu0 %v2123_v16  ;;  %1930 = vmatpush3.bf16.msra.mxu1 %v2125_v18 }
  0x58   : > { %1935 = vmatprep.subr.bf16.mxu0 %v2281_v0  ;;  %1941 = vmatprep.subr.bf16.mxu1 %v2281_v0 }
  0xcd   : > { %v526_v19 = vpop.xlane.xlu0 %525 }
  0xce   : > { %v527_v20 = vmul.f32 0.03125, %v526_v19 }
  0xcf   : > { %v530_v21 = vpop.xlane.xlu1 %529 }
  0xd0   : > { %v532_v22 = vmul.f32 %v527_v20, %v527_v20  ;;  %v531_v23 = vmul.f32 0.03125, %v530_v21  ;;  %v534_v33 = vsub.f32 %v2474_v1, %v527_v20 }
  0xd1   : > { %v725_v24 = vpop.xlane.xlu0 %724 }
  0xd2   : > { %v533_v25 = vsub.f32 %v531_v23, %v532_v22  ;;  %v726_v26 = vmul.f32 0.03125, %v725_v24 }
  0xd3   : > { %v729_v27 = vpop.xlane.xlu1 %728 }
  0xd4   : > { %v535_v28 = vadd.f32 1e-05, %v533_v25  ;;  %v731_v29 = vmul.f32 %v726_v26, %v726_v26  ;;  %v730_v30 = vmul.f32 0.03125, %v729_v27  ;;  %v733_v38 = vsub.f32 %v2474_v1, %v726_v26 }
  0xd6   : > { %2144 = vrsqrt.f32 %v535_v28  ;;  %v732_v31 = vsub.f32 %v730_v30, %v731_v29 }
  0xd8   : > { %v734_v32 = vadd.f32 1e-05, %v732_v31 }
  0xda   : > { %2146 = vrsqrt.f32 %v734_v32 }
  0xe0   : > { %v2145_v34 = vpop.eup %2144 }
  0xe1   : > { %v537_v36 = vmul.f32 %v2145_v34, %v534_v33 }
  0xe3   : > { %v544_v39 = vmul.f32 %v1772_v35, %v537_v36 }
  0xe4   : > { %v2147_v40 = vpop.eup %2146 }
  0xe5   : > { %v551_v41 = vadd.f32 %v1773_v37, %v544_v39  ;;  %v736_v42 = vmul.f32 %v2147_v40, %v733_v38 }
  0xe7   : > { %v552_v43 = vpack.c.bf16 %v551_v41, %v551_v41  ;;  %v743_v44 = vmul.f32 %v1772_v35, %v736_v42 }
  0xe9   : > { %1912 = vmatmul.mubr.bf16.vlgmr.msra.gmra.mrb[0].mxu0 %v552_v43  ;;  %v750_v45 = vadd.f32 %v1773_v37, %v743_v44 }
  0xea   : > { %1937 = vmatprep.mubr.msk.bf16.mxu0 %vm2282_vm0, %v2281_v0 }
  0xeb   : > { %v751_v46 = vpack.c.bf16 %v750_v45, %v750_v45 }
  0xed   : > { %1932 = vmatmul.mubr.bf16.vlgmr.msra.gmra.mrb[0].mxu1 %v751_v46 }
  0xee   : > { %1943 = vmatprep.mubr.msk.bf16.mxu1 %vm2282_vm0, %v2281_v0 }
 0x1bc   : > { %v658_v48 = vpop.f32.mrb[0].mxu0 }
 0x1bd   : > { %v659_v49 = vadd.f32 %v1774_v47, %v658_v48  ;;  %v1913_v50 = vpop.f32.mrb[1].mxu0 }
 0x1be   : > { %v661_v51 = vpop.f32.mrb[2].mxu0 }
 0x1bf   : > { %v2563_v53 = vpack.c.bf16 %v659_v49, %v659_v49  ;;  %v1914_v54 = vpop.f32.mrb[3].mxu0 }
 0x1c0   : > { %v857_v55 = vpop.f32.mrb[0].mxu1 }
 0x1c1   : > { %v858_v56 = vadd.f32 %v1788_v52, %v857_v55  ;;  %665 = vxpose.xlu0.c.b16.start.end [1/1] (short) (narrow) %v2563_v53, 32  ;;  %v1933_v57 = vpop.f32.mrb[1].mxu1 }
 0x1c2   : > { %v860_v58 = vpop.f32.mrb[2].mxu1 }
 0x1c3   : > { %v863_v59 = vpack.c.bf16 %v858_v56, %v858_v56  ;;  %v1934_v60 = vpop.f32.mrb[3].mxu1 }
 0x1c5   : > { %978 = vrot.lane.b32.xlu1 %v863_v59, %s2283_s24  ;;  %s2291_s24 = smov 16  }
 0x1c9   : > { %1097 = vrot.lane.b32.xlu1 %v863_v59, %s2284_s25  ;;  %s2292_s25 = smov 24  }
 0x1cd   : > { %1216 = vrot.lane.b32.xlu1 %v863_v59, %s2285_s22 }
 0x227   : > { %v673_v61 = vpop.trf.xlu0 }
 0x228   : > { %682 = vst.msk [vmem:[#allocation2] sm:$0xf] %vm681_vm1, %v673_v61  ;;  %v1784_v62 = vcombine.high %v673_v61, %v673_v61 }
 0x22a   : > { %695 = vst.msk [vmem:[#allocation2 + $0x4] sm:$0xf] %vm681_vm1, %v1784_v62 }
 0x22b   : > { %v674_v63 = vpop.trf.xlu0 }
 0x22c   : > { %702 = vst.msk [vmem:[#allocation2 + $0x8] sm:$0xf] %vm681_vm1, %v674_v63  ;;  %v1785_v2 = vcombine.high %v674_v63, %v674_v63 }
 0x22e   : > { %713 = vst.msk [vmem:[#allocation2 + $0xc] sm:$0xf] %vm681_vm1, %v1785_v2 }
 0x22f   : > { %v864_v3 = vld [vmem:[#allocation2] sm:$0xf] }
 0x230   : > { %v871_v4 = vsel %vm869_vm2, %v864_v3, 0 }
 0x231   : > { %1936 = vmatpush3.bf16.msra.mxu0 %v871_v4  ;;  %v976_v5 = vld [vmem:[#allocation2 + $0x4] sm:$0xf] }
 0x232   : > { %1947 = vmatprep.subr.bf16.mxu0 %v2281_v0  ;;  %v984_v6 = vsel %vm869_vm2, %v976_v5, 0 }
 0x233   : > { %v1096_v7 = vld [vmem:[#allocation2 + $0x8] sm:$0xf] }
 0x234   : > { %1938 = vmatmul.mubr.msk.bf16.vlgmr.msra.gmra.mrb[4].mxu0 %vm865_vm3, %v863_v59  ;;  %v1103_v8 = vsel %vm869_vm2, %v1096_v7, 0 }
 0x235   : > { %1948 = vmatpush3.bf16.msra.mxu0 %v984_v6  ;;  %1949 = vmatprep.mubr.msk.bf16.mxu0 %vm2282_vm0, %v2281_v0  ;;  %v1215_v10 = vld [vmem:[#allocation2 + $0xc] sm:$0xf] }
 0x236   : > { %1959 = vmatprep.subr.bf16.mxu0 %v2281_v0  ;;  %v1222_v11 = vsel %vm869_vm2, %v1215_v10, 0 }
 0x237   : > { %v979_v9 = vpop.permute.xlu1 %978 }
 0x23b   : > { %v1098_v12 = vpop.permute.xlu1 %1097 }
 0x23c   : > { %1950 = vmatmul.mubr.msk.bf16.vlgmr.msra.gmra.mrb[8].mxu0 %vm865_vm3, %v979_v9 }
 0x23d   : > { %1960 = vmatpush3.bf16.msra.mxu0 %v1103_v8  ;;  %1961 = vmatprep.mubr.msk.bf16.mxu0 %vm2282_vm0, %v2281_v0 }
 0x23e   : > { %1971 = vmatprep.subr.bf16.mxu0 %v2281_v0 }
 0x23f   : > { %v1217_v13 = vpop.permute.xlu1 %1216 }
 0x244   : > { %1962 = vmatmul.mubr.msk.bf16.vlgmr.msra.gmra.mrb[12].mxu0 %vm865_vm3, %v1098_v12 }
 0x245   : > { %1972 = vmatpush3.bf16.msra.mxu0 %v1222_v11  ;;  %1973 = vmatprep.mubr.msk.bf16.mxu0 %vm2282_vm0, %v2281_v0 }
 0x246   : > { %1983 = vmatprep.subr.bf16.mxu0 %v2281_v0 }
 0x24c   : > { %1974 = vmatmul.mubr.msk.bf16.vlgmr.msra.gmra.mrb[16].mxu0 %vm865_vm3, %v1217_v13 }
 0x24d   : > { %1987 = vmatprep.mubr.msk.bf16.mxu0 %vm2282_vm0, %v2281_v0 }
 0x307   : > { %v907_v14 = vpop.f32.mrb[4].mxu0 }
 0x308   : > { %v1939_v15 = vpop.f32.mrb[5].mxu0  ;;  %v913_v16 = vsel %vm865_vm3, %v907_v14, -inf }
 0x309   : > { %914 = vmax.xlane.f32.xlu1 %v913_v16  ;;  %v910_v17 = vpop.f32.mrb[6].mxu0 }
 0x30a   : > { %v1940_v18 = vpop.f32.mrb[7].mxu0 }
 0x30f   : > { %v1020_v19 = vpop.f32.mrb[8].mxu0 }
 0x310   : > { %v1951_v20 = vpop.f32.mrb[9].mxu0  ;;  %v1026_v21 = vsel %vm865_vm3, %v1020_v19, -inf }
 0x311   : > { %1027 = vmax.xlane.f32.xlu0 %v1026_v21  ;;  %v1023_v22 = vpop.f32.mrb[10].mxu0 }
 0x312   : > { %v1952_v23 = vpop.f32.mrb[11].mxu0 }
 0x317   : > { %v1139_v24 = vpop.f32.mrb[12].mxu0 }
 0x318   : > { %v1963_v25 = vpop.f32.mrb[13].mxu0  ;;  %v1145_v26 = vsel %vm865_vm3, %v1139_v24, -inf }
 0x319   : > { %1146 = vmax.xlane.f32.xlu1 %v1145_v26  ;;  %v1142_v27 = vpop.f32.mrb[14].mxu0 }
 0x31a   : > { %v1964_v28 = vpop.f32.mrb[15].mxu0 }
 0x31f   : > { %v1258_v29 = vpop.f32.mrb[16].mxu0 }
 0x320   : > { %v1975_v30 = vpop.f32.mrb[17].mxu0  ;;  %v1264_v31 = vsel %vm865_vm3, %v1258_v29, -inf }
 0x321   : > { %1265 = vmax.xlane.f32.xlu0 %v1264_v31  ;;  %v1261_v32 = vpop.f32.mrb[18].mxu0  ;;  %v2126_v30 = vld [vmem:[%s2781_s7] sm:$0xff]  }
 0x322   : > { %v1976_v33 = vpop.f32.mrb[19].mxu0  ;;  %1984 = vmatpush3.bf16.msra.mxu0 %v2126_v30 }
 0x323   : > { %1985 = vmatprep.subr.bf16.mxu0 %v2281_v0 }
 0x32a   : > { %696 = vrot.lane.b32.xlu1 %v2563_v53, %s2286_s20  ;;  %s2727_s20 = scalar_lea.hbm %s2789_s15, %s1833_s18 }
 0x337   : > { %686 = vrot.lane.b32.xlu0 %v2563_v53, %s2287_s27 }
 0x396   : > { %v915_v34 = vpop.xlane.xlu1 %914 }
 0x397   : > { %v916_v35 = vsub.f32 %v907_v14, %v915_v34  ;;  %v2127_v34 = vld [vmem:[%s2781_s7 + $0x8] sm:$0xff]  }
 0x398   : > { %1986 = vmatpush3.bf16.msra.mxu0 %v2127_v34 }
 0x399   : > { %v917_v36 = vmul.f32 1.442695, %v916_v35  ;;  %2011 = vmatprep.subr.bf16.mxu0 %v2281_v0 }
 0x39b   : > { %2148 = vpow2.f32 %v917_v36 }
 0x39e   : > { %v1028_v37 = vpop.xlane.xlu0 %1027 }
 0x39f   : > { %v1029_v38 = vsub.f32 %v1020_v19, %v1028_v37 }
 0x3a1   : > { %v1030_v39 = vmul.f32 1.442695, %v1029_v38 }
 0x3a3   : > { %2150 = vpow2.f32 %v1030_v39 }
 0x3a5   : > { %v2149_v40 = vpop.eup %2148 }
 0x3a6   : > { %v1147_v41 = vpop.xlane.xlu1 %1146  ;;  %v919_v42 = vsel %vm865_vm3, %v2149_v40, 0.0 }
 0x3a7   : > { %v1148_v43 = vsub.f32 %v1139_v24, %v1147_v41  ;;  %920 = vadd.xlane.f32.xlu1 %v919_v42 }
 0x3a9   : > { %v1149_v44 = vmul.f32 1.442695, %v1148_v43 }
 0x3aa   : > { %v697_v45 = vpop.permute.xlu1 %696 }
 0x3ab   : > { %2152 = vpow2.f32 %v1149_v44  ;;  %700 = vst.msk [vmem:[#allocation3 + $0x4] sm:$0xf] %vm681_vm1, %v697_v45 }
 0x3ad   : > { %v2151_v46 = vpop.eup %2150 }
 0x3ae   : > { %v1266_v47 = vpop.xlane.xlu0 %1265  ;;  %v1032_v48 = vsel %vm865_vm3, %v2151_v46, 0.0 }
 0x3af   : > { %v1267_v49 = vsub.f32 %v1258_v29, %v1266_v47  ;;  %1033 = vadd.xlane.f32.xlu0 %v1032_v48  ;;  %v1808_v47 = vld [vmem:[%s2782_s8] ss:$0 sm:$0xff] }
 0x3b1   : > { %v1268_v50 = vmul.f32 1.442695, %v1267_v49 }
 0x3b2   : > { %v687_v51 = vpop.permute.xlu0 %686  ;;  %v1039_v2 = vld [vmem:[#allocation3 + $0x4] sm:$0xf] }
 0x3b3   : > { %2154 = vpow2.f32 %v1268_v50  ;;  %689 = vst.msk [vmem:[#allocation3] sm:$0xf] %vm681_vm1, %v687_v51  ;;  %v1044_v5 = vsel %vm869_vm2, %v1039_v2, 0 }
 0x3b5   : > { %v2153_v52 = vpop.eup %2152 }
 0x3b6   : > { %v1151_v54 = vsel %vm865_vm3, %v2153_v52, 0.0 }
 0x3b7   : > { %1152 = vadd.xlane.f32.xlu1 %v1151_v54 }
 0x3ba   : > { %v925_v55 = vld [vmem:[#allocation3] sm:$0xf] }
 0x3bb   : > { %v930_v56 = vsel %vm869_vm2, %v925_v55, 0 }
 0x3bc   : > { %1942 = vmatpush3.bf16.msra.mxu1 %v930_v56  ;;  %v2129_v56 = vld [vmem:[%s2785_s11 + $0x8] sm:$0xff]  }
 0x3bd   : > { %v2155_v57 = vpop.eup %2154  ;;  %1953 = vmatprep.subr.bf16.mxu1 %v2281_v0 }
 0x3be   : > { %v1270_v58 = vsel %vm865_vm3, %v2155_v57, 0.0 }
 0x3bf   : > { %1271 = vadd.xlane.f32.xlu1 %v1270_v58  ;;  %v2132_v58 = vld [vmem:[%s2785_s11 + $0x20] sm:$0xff]  }
 0x3c5   : > { %703 = vrot.lane.b32.xlu0 %v2563_v53, %s2288_s23  ;;  %s2293_s23 = smov [#allocation8]  }
 0x3d0   : > { %714 = vrot.lane.b32.xlu1 %v2563_v53, %s2289_s26  ;;  %s510_s26 = sand.u32 1, %s2262_s19  }
 0x3d1   : > { %s1667_s21 = scalar_lea.sflag [#allocation7], %s510_s26 }
 0x434   : > { %v921_v59 = vpop.xlane.xlu1 %920 }
 0x435   : > { %2156 = vrcp.f32 %v921_v59  ;;  %v2133_v59 = vld [vmem:[%s2785_s11 + $0x28] sm:$0xff]  }
 0x43c   : > { %v1034_v60 = vpop.xlane.xlu0 %1033 }
 0x43d   : > { %2158 = vrcp.f32 %v1034_v60  ;;  %v2134_v60 = vld [vmem:[%s2785_s11 + $0x30] sm:$0xff]  }
 0x43f   : > { %v2157_v61 = vpop.eup %2156 }
 0x440   : > { %v923_v62 = vmul.f32 %v2157_v61, %v2149_v40  ;;  %v704_v63 = vpop.permute.xlu0 %703  ;;  %v2135_v61 = vld [vmem:[%s2785_s11 + $0x38] sm:$0xff]  }
 0x441   : > { %707 = vst.msk [vmem:[#allocation3 + $0x8] sm:$0xf] %vm681_vm1, %v704_v63 }
 0x442   : > { %v924_v3 = vpack.c.bf16 %v923_v62, %v923_v62  ;;  %v2136_v62 = vld [vmem:[%s2787_s13] sm:$0xff]  }
 0x444   : > { %v1153_v4 = vpop.xlane.xlu1 %1152  ;;  %1944 = vmatmul.mubr.msk.bf16.vlgmr.msra.gmra.mrb[4].mxu1 %vm865_vm3, %v924_v3 }
 0x445   : > { %2160 = vrcp.f32 %v1153_v4  ;;  %1954 = vmatpush3.bf16.msra.mxu1 %v1044_v5  ;;  %1955 = vmatprep.mubr.msk.bf16.mxu1 %vm2282_vm0, %v2281_v0 }
 0x446   : > { %1965 = vmatprep.subr.bf16.mxu1 %v2281_v0 }
 0x447   : > { %v2159_v53 = vpop.eup %2158 }
 0x448   : > { %v1036_v6 = vmul.f32 %v2159_v53, %v2151_v46  ;;  %v1158_v7 = vld [vmem:[#allocation3 + $0x8] sm:$0xf]  ;;  %v2128_v46 = vld [vmem:[%s2785_s11] sm:$0xff]  }
 0x449   : > { %v1163_v10 = vsel %vm869_vm2, %v1158_v7, 0 }
 0x44a   : > { %v1037_v8 = vpack.c.bf16 %v1036_v6, %v1036_v6 }
 0x44c   : > { %v1272_v9 = vpop.xlane.xlu1 %1271  ;;  %1956 = vmatmul.mubr.msk.bf16.vlgmr.msra.gmra.mrb[8].mxu1 %vm865_vm3, %v1037_v8 }
 0x44d   : > { %2162 = vrcp.f32 %v1272_v9  ;;  %1966 = vmatpush3.bf16.msra.mxu1 %v1163_v10  ;;  %1967 = vmatprep.mubr.msk.bf16.mxu1 %vm2282_vm0, %v2281_v0  ;;  %v1812_v9 = vld [vmem:[%s2783_s9] ss:$0 sm:$0xff] }
 0x44e   : > { %1977 = vmatprep.subr.bf16.mxu1 %v2281_v0 }
 0x44f   : > { %v2161_v11 = vpop.eup %2160 }
 0x450   : > { %v1155_v12 = vmul.f32 %v2161_v11, %v2153_v52  ;;  %v715_v13 = vpop.permute.xlu1 %714  ;;  %v1813_v11 = vld [vmem:[%s2784_s10] ss:$0 sm:$0xff] }
 0x451   : > { %718 = vst.msk [vmem:[#allocation3 + $0xc] sm:$0xf] %vm681_vm1, %v715_v13 }
 0x452   : > { %v1156_v14 = vpack.c.bf16 %v1155_v12, %v1155_v12 }
 0x454   : > { %1968 = vmatmul.mubr.msk.bf16.vlgmr.msra.gmra.mrb[12].mxu1 %vm865_vm3, %v1156_v14 }
 0x455   : > { %1979 = vmatprep.mubr.msk.bf16.mxu1 %vm2282_vm0, %v2281_v0 }
 0x457   : > { %v2163_v15 = vpop.eup %2162 }
 0x458   : > { %v1274_v16 = vmul.f32 %v2163_v15, %v2155_v57  ;;  %v1277_v17 = vld [vmem:[#allocation3 + $0xc] sm:$0xf]  ;;  %v2130_v57 = vld [vmem:[%s2785_s11 + $0x10] sm:$0xff]   ;;  %v2137_v15 = vld [vmem:[%s2787_s13 + $0x8] sm:$0xff]  }
 0x459   : > { %v1282_v18 = vsel %vm869_vm2, %v1277_v17, 0  ;;  %v2139_v17 = vld [vmem:[%s2787_s13 + $0x18] sm:$0xff]  }
 0x45a   : > { %1978 = vmatpush3.bf16.msra.mxu1 %v1282_v18  ;;  %v1275_v19 = vpack.c.bf16 %v1274_v16, %v1274_v16  ;;  %v2138_v16 = vld [vmem:[%s2787_s13 + $0x10] sm:$0xff]   ;;  %v2140_v18 = vld [vmem:[%s2787_s13 + $0x20] sm:$0xff]  }
 0x45b   : > { %1991 = vmatprep.subr.bf16.mxu1 %v2281_v0 }
 0x45d   : > { %1980 = vmatmul.mubr.msk.bf16.vlgmr.msra.gmra.mrb[16].mxu1 %vm865_vm3, %v1275_v19  ;;  %v2141_v19 = vld [vmem:[%s2787_s13 + $0x28] sm:$0xff]  }
 0x45e   : > { %2007 = vmatprep.mubr.msk.bf16.mxu1 %vm2282_vm0, %v2281_v0  ;;  %1992 = vmatpush3.bf16.msra.mxu1 %v2128_v46 }
 0x45f   : > { %1993 = vmatprep.subr.bf16.mxu1 %v2281_v0 }
 0x462   : > { %1994 = vmatpush3.bf16.msra.mxu1 %v2129_v56 }
 0x463   : > { %1995 = vmatprep.subr.bf16.mxu1 %v2281_v0 }
 0x466   : > { %1996 = vmatpush3.bf16.msra.mxu1 %v2130_v57 }
 0x467   : > { %1997 = vmatprep.subr.bf16.mxu1 %v2281_v0 }
 0x517   : > { %v966_v20 = vpop.f32.mrb[4].mxu1 }
 0x518   : > { %v972_v21 = vpack.c.bf16 %v966_v20, %v966_v20  ;;  %v1945_v22 = vpop.f32.mrb[5].mxu1  ;;  %v2142_v20 = vld [vmem:[%s2787_s13 + $0x30] sm:$0xff]  }
 0x519   : > { %v969_v23 = vpop.f32.mrb[6].mxu1  ;;  %v1814_v22 = vld [vmem:[%s2786_s12] ss:$0 sm:$0xff] }
 0x51a   : > { %974 = vst.msk [vmem:[#allocation4] sm:$0xf] %vm681_vm1, %v972_v21  ;;  %v1946_v24 = vpop.f32.mrb[7].mxu1  ;;  %v2143_v21 = vld [vmem:[%s2787_s13 + $0x38] sm:$0xff]  }
 0x51f   : > { %v1080_v25 = vpop.f32.mrb[8].mxu1 }
 0x520   : > { %v1837_v26 = vpack.c.bf16 %v1080_v25, %v1080_v25  ;;  %v1957_v27 = vpop.f32.mrb[9].mxu1 }
 0x521   : > { %v1083_v28 = vpop.f32.mrb[10].mxu1 }
 0x522   : > { %1090 = vrot.lane.b32.xlu0 %v1837_v26, %s2290_s30  ;;  %v1958_v29 = vpop.f32.mrb[11].mxu1  ;;  %s1770_s30 = sshll.u32 %s510_s26, 3 }
 0x523   : > { %s512_s29 = scalar_lea.vmem [#allocation8], %s1770_s30  ;;  %s2200_s30 = sshll.u32 %s2293_s23, 4  ;;  %s2201_s30 = int_to_ptr.vmem [resolvable:$false] %s2200_s30 }
 0x524   : > { %s2202_s16 = scalar_lea.vmem %s2201_s30, 256 }
 0x527   : > { %v1199_v31 = vpop.f32.mrb[12].mxu1 }
 0x528   : > { %v1838_v32 = vpack.c.bf16 %v1199_v31, %v1199_v31  ;;  %v1969_v33 = vpop.f32.mrb[13].mxu1 }
 0x529   : > { %v1202_v35 = vpop.f32.mrb[14].mxu1 }
 0x52a   : > { %1209 = vrot.lane.b32.xlu1 %v1838_v32, %s2291_s24  ;;  %v1970_v36 = vpop.f32.mrb[15].mxu1  ;;  %s1681_s24 = sshll.u32 %s512_s29, 4  ;;  %s2729_s24 = int_to_ptr.vmem [resolvable:$true] %s1681_s24 }
 0x52b   : > { %s2196_s27 = scalar_lea.vmem %s2729_s24, 128  ;;  %p2203_p1 = scmp.lt.s32.totalorder %s2729_s24, %s2201_s30 }
 0x52c   : > { %p2197_p8 = scmp.ne.s32.totalorder %s2729_s24, %s2196_s27  ;;  %p2204_p3 = scmp.lt.s32.totalorder %s2202_s16, %s2196_s27 }
 0x52e   : > { %p2198_p11 = pnand %p2197_p8, %p2815_p10  ;;  %p2205_p5 = por %p2204_p3, %p2203_p1 }
 0x530   : > { %v1318_v37 = vpop.f32.mrb[16].mxu1  ;;  %p2199_p13 = pneg %p2198_p11 }
 0x531   : > { %v1839_v38 = vpack.c.bf16 %v1318_v37, %v1318_v37  ;;  %v1981_v39 = vpop.f32.mrb[17].mxu1  ;;  %v1823_v37 = vld [vmem:[%s2788_s14] ss:$0 sm:$0xff] }
 0x532   : > { %v1321_v40 = vpop.f32.mrb[18].mxu1  ;;  %p2206_p6 = pnand %p2205_p5, %p2199_p13 }
 0x533   : > { %1328 = vrot.lane.b32.xlu0 %v1839_v38, %s2292_s25  ;;  %v1982_v41 = vpop.f32.mrb[19].mxu1 }
 0x594   : > { %v1091_v42 = vpop.permute.xlu0 %1090 }
 0x595   : > { %1094 = vst.msk [vmem:[#allocation4] sm:$0xf] %vm1093_vm4, %v1091_v42 }
 0x59c   : > { %v1210_v43 = vpop.permute.xlu1 %1209 }
 0x59d   : > { %1213 = vst.msk [vmem:[#allocation4] sm:$0xf] %vm1212_vm5, %v1210_v43 }
 0x5a5   : > { %v1329_v44 = vpop.permute.xlu0 %1328 }
 0x5a6   : > { %1332 = vst.msk [vmem:[#allocation4] sm:$0xf] %vm1331_vm6, %v1329_v44 }
 0x5ad   : > { %v1333_v45 = vld [vmem:[#allocation4] sm:$0xf] }
 0x5ae   : > { %1988 = vmatmul.mubr.msk.bf16.vlgmr.msra.gmra.mrb[20].mxu0 %vm1357_vm7, %v1333_v45 }
 0x5af   : > { %2027 = vmatprep.mubr.msk.bf16.mxu0 %vm2282_vm0, %v2281_v0  ;;  %2012 = vmatpush3.bf16.msra.mxu0 %v2136_v62 }
 0x5b0   : > { %2013 = vmatprep.subr.bf16.mxu0 %v2281_v0 }
 0x5b3   : > { %2014 = vmatpush3.bf16.msra.mxu0 %v2137_v15 }
 0x5b4   : > { %2015 = vmatprep.subr.bf16.mxu0 %v2281_v0 }
 0x5b7   : > { %2016 = vmatpush3.bf16.msra.mxu0 %v2138_v16 }
 0x5b8   : > { %2017 = vmatprep.subr.bf16.mxu0 %v2281_v0 }
 0x5bb   : > { %2018 = vmatpush3.bf16.msra.mxu0 %v2139_v17 }
 0x5bc   : > { %2019 = vmatprep.subr.bf16.mxu0 %v2281_v0 }
 0x5bf   : > { %2020 = vmatpush3.bf16.msra.mxu0 %v2140_v18 }
 0x5c0   : > { %2021 = vmatprep.subr.bf16.mxu0 %v2281_v0 }
 0x5c3   : > { %2022 = vmatpush3.bf16.msra.mxu0 %v2141_v19 }
 0x5c4   : > { %2023 = vmatprep.subr.bf16.mxu0 %v2281_v0 }
 0x5c7   : > { %2024 = vmatpush3.bf16.msra.mxu0 %v2142_v20 }
 0x5c8   : > { %2025 = vmatprep.subr.bf16.mxu0 %v2281_v0 }
 0x5cb   : > { %2026 = vmatpush3.bf16.msra.mxu0 %v2143_v21 }
 0x681   : > { %v1395_v48 = vpop.f32.mrb[20].mxu0 }
 0x682   : > { %v1396_v49 = vadd.f32 %v1808_v47, %v1395_v48  ;;  %v1989_v50 = vpop.f32.mrb[21].mxu0 }
 0x683   : > { %v1398_v51 = vpop.f32.mrb[22].mxu0 }
 0x684   : > { %v2645_v52 = vadd.f32 %v1396_v49, %v2474_v1  ;;  %v1990_v54 = vpop.f32.mrb[23].mxu0  ;;  %v2131_v1 = vld [vmem:[%s2785_s11 + $0x18] sm:$0xff]  }
 0x685   : > { %1998 = vmatpush3.bf16.msra.mxu1 %v2131_v1 }
 0x686   : > { %1404 = vadd.xlane.f32.xlu1 %v2645_v52  ;;  %v1407_v55 = vmul.f32 %v2645_v52, %v2645_v52  ;;  %1999 = vmatprep.subr.bf16.mxu1 %v2281_v0 }
 0x688   : > { %1408 = vadd.xlane.f32.xlu0 %v1407_v55 }
 0x689   : > { %2000 = vmatpush3.bf16.msra.mxu1 %v2132_v58 }
 0x68a   : > { %2001 = vmatprep.subr.bf16.mxu1 %v2281_v0 }
 0x68d   : > { %2002 = vmatpush3.bf16.msra.mxu1 %v2133_v59 }
 0x68e   : > { %2003 = vmatprep.subr.bf16.mxu1 %v2281_v0 }
 0x691   : > { %2004 = vmatpush3.bf16.msra.mxu1 %v2134_v60 }
 0x692   : > { %2005 = vmatprep.subr.bf16.mxu1 %v2281_v0 }
 0x695   : > { %2006 = vmatpush3.bf16.msra.mxu1 %v2135_v61 }
 0x713   : > { %v1405_v63 = vpop.xlane.xlu1 %1404 }
 0x714   : > { %v1406_v2 = vmul.f32 0.03125, %v1405_v63 }
 0x715   : > { %v1409_v3 = vpop.xlane.xlu0 %1408 }
 0x716   : > { %v1411_v4 = vmul.f32 %v1406_v2, %v1406_v2  ;;  %v1410_v5 = vmul.f32 0.03125, %v1409_v3  ;;  %v1413_v7 = vsub.f32 %v2645_v52, %v1406_v2 }
 0x718   : > { %v1412_v53 = vsub.f32 %v1410_v5, %v1411_v4 }
 0x71a   : > { %v1414_v6 = vadd.f32 1e-05, %v1412_v53 }
 0x71c   : > { %2164 = vrsqrt.f32 %v1414_v6 }
 0x726   : > { %v2165_v8 = vpop.eup %2164 }
 0x727   : > { %v1416_v10 = vmul.f32 %v2165_v8, %v1413_v7 }
 0x729   : > { %v1423_v12 = vmul.f32 %v1812_v9, %v1416_v10 }
 0x72b   : > { %v1430_v13 = vadd.f32 %v1813_v11, %v1423_v12 }
 0x72d   : > { %v1431_v14 = vpack.c.bf16 %v1430_v13, %v1430_v13 }
 0x72f   : > { %2008 = vmatmul.mubr.bf16.vlgmr.msra.gmra.mrb[20].mxu1 %v1431_v14 }
 0x802   : > { %v1537_v23 = vpop.f32.mrb[20].mxu1 }
 0x803   : > { %v1538_v24 = vadd.f32 %v1814_v22, %v1537_v23  ;;  %v2009_v25 = vpop.f32.mrb[21].mxu1 }
 0x804   : > { %v1540_v26 = vpop.f32.mrb[22].mxu1 }
 0x805   : > { %v1544_v27 = vmul.f32 0.044715, %v1538_v24  ;;  %v2010_v28 = vpop.f32.mrb[23].mxu1  ;;  %v1543_v0 = vmul.f32 0.5, %v1538_v24 }
 0x807   : > { %v1545_v29 = vmul.f32 %v1544_v27, %v1538_v24 }
 0x809   : > { %v1546_v30 = vmul.f32 %v1545_v29, %v1538_v24 }
 0x80b   : > { %v1547_v31 = vadd.f32 %v1546_v30, %v1538_v24 }
 0x80d   : > { %v1548_v32 = vmul.f32 0.7978846, %v1547_v31 }
 0x80f   : > { %2166 = vtanh.f32 %v1548_v32 }
 0x819   : > { %v2167_v33 = vpop.eup %2166 }
 0x81a   : > { %v1550_v34 = vadd.f32 1.0, %v2167_v33 }
 0x81c   : > { %v1551_v35 = vmul.f32 %v1550_v34, %v1543_v0 }
 0x81e   : > { %v1552_v36 = vpack.c.bf16 %v1551_v35, %v1551_v35 }
 0x820   : > { %2028 = vmatmul.mubr.bf16.vlgmr.msra.gmra.mrb[24].mxu0 %v1552_v36 }
 0x8f3   : > { %v1658_v38 = vpop.f32.mrb[24].mxu0 }
 0x8f4   : > { %v1659_v39 = vadd.f32 %v1823_v37, %v1658_v38  ;;  %v2029_v40 = vpop.f32.mrb[25].mxu0 }
 0x8f5   : > { %v1661_v41 = vpop.f32.mrb[26].mxu0 }
 0x8f6   : > { %v1664_v42 = vadd.f32 %v1659_v39, %v2645_v52  ;;  %v2030_v43 = vpop.f32.mrb[27].mxu0 }
 0x8f8   : > { %1665 = vst [vmem:[%s512_s29] sm:$0xff] %v1664_v42 }
 0x8f9   : > { %2209 = shalt.err (!%p2206_p6)
}
 0x8fa   : > { %s2210_s26 = scalar_lea.hbm %s2727_s20, 128  ;;  %s2214_s29 = scalar_lea.hbm %s2789_s15, 256 }
 0x8fb   : > { %p2211_p7 = scmp.ne.s32.totalorder %s2727_s20, %s2210_s26  ;;  %p2215_p0 = scmp.lt.u32.totalorder %s2727_s20, %s2789_s15 }
 0x8fc   : > { %p2216_p2 = scmp.lt.u32.totalorder %s2214_s29, %s2210_s26  ;;  %p2218_p8 = scmp.lt.u32.totalorder %s2210_s26, %s2727_s20 }
 0x8fd   : > { %p2212_p9 = pnand %p2211_p7, %p2815_p10 }
 0x8fe   : > { %p2217_p4 = por %p2216_p2, %p2215_p0 }
 0x8ff   : > { %p2213_p12 = pneg %p2212_p9 }
 0x900   : > { %p2219_p11 = por %p2218_p8, %p2217_p4 }
 0x902   : > { %p2220_p13 = pnand %p2219_p11, %p2213_p12 }
 0x904   : > { %2223 = shalt.err (!%p2220_p13)
}
 0x905   : > { %2035 = dma.vmem_to_hbm [thread:$0]  (%p2815_p10), %s2729_s24, 128, %s2727_s20, %s1667_s21  }
 0x906 PF: > { %s2816_s27 = sld [smem:[#allocation14_spill]]  ;;  %s2817_s23 = sld [smem:[#allocation11_spill]] }
 0x907   : > { %s2818_s30 = sld [smem:[#allocation16_spill]] }
 0x90c   : > { %p2047_p1 = scmp.ge.s32.totalorder %s2816_s27, 2  ;;  %s1693_s16 = sand.u32 1, %s2817_s23  }
 0x90d   : > { %p2819_p3 = scmp.ne.s32.totalorder %s2818_s30, 0  ;;  %s1694_s17 = scalar_lea.sflag [#allocation7], %s1693_s16 }
 0x90f   : > { %p2042_p5 = pnand %p2047_p1, %p2819_p3 }
 0x911   : > { %2253 = dma.done.wait (!%p2042_p5), %s1694_s17, 128  }
 0x912   : > { %2255 = vsyncadd (!%p2042_p5), %s1694_s17, 4294967168  ;;  %s29_s23 = sadd.s32 1, %s2816_s27   ;;  %s2820_s26 = sld [smem:[#allocation12_spill]] }
 0x913   : > { %p26_p6 = scmp.ge.s32.totalorder %s29_s23, 4   ;;  %s2821_s20 = sld [smem:[#allocation17_spill]] }
 0x914   : > { %s2822_s21 = sld [smem:[#allocation13_spill]]  ;;  %s2823_s22 = sld [smem:[#allocation15_spill]] }
 0x915   : > { %s2824_s18 = smov %s2262_s19  ;;  %28 = sbr.rel (!%p26_p6) target bundleno = 5 (0x5), region = 137 }
 0x918   : > { %s2825_s19 = smov %s2820_s26 }
 0x91c   :  { %1699 = vsyncpa [#allocation6], 1 }
 0x91d   :  { %1701 = vsyncpa [#allocation6 + $0x1], 1 }
 0x91e   :  { %1702 = vsyncpa [#allocation7], 1 }
 0x91f   :  { %1704 = vsyncpa [#allocation7 + $0x1], 1 }

</bundles_post_ra>
